<compile_context>
chip_gen: v7x
topology: tpu7x:2x2x1
jax: 0.10.0
libtpu: 0.0.40
codegen_flags: <defaults>
</compile_context>

<pallas_src>
import functools

import jax
import jax.numpy as jnp
from jax.experimental import pallas as pl
from jax.experimental.pallas import tpu as pltpu


def _round_up(x, m):
    return (x + m - 1) // m * m


def ritznet_kernel(xT_ref, win_ref, bin_ref, wh_ref, bh_ref, wout_ref,
                   bout_ref, oT_ref, *, depth):
    """Full RitzNet forward for one batch tile (batch on lanes).

    xT_ref  : (d_pad, tile_n)           compute dtype (f32 or bf16)
    win_ref : (width_pad, d_pad)        PyTorch-native (out, in) layout
    bin_ref : (width_pad, 1)            f32
    wh_ref  : (depth, width_pad, width_pad)
    bh_ref  : (depth, width_pad, 1)     f32
    wout_ref: (dd, width_pad)
    bout_ref: (dd, 1)                   f32
    oT_ref  : (dd, tile_n)              f32
    """
    cdt = win_ref.dtype  # compute (MXU input) dtype, set by the wrapper

    x = xT_ref[...]
    # input layer + tanh  (accumulate in f32, tanh in f32)
    b_in = bin_ref[...]                       # hoist bias read once
    h = jnp.tanh(
        jnp.dot(win_ref[...], x, preferred_element_type=jnp.float32) + b_in)

    # hidden layers: depth is static -> unrolled, all layers on MXU/EUP
    for i in range(depth):
        w = wh_ref[i]
        b = bh_ref[i]
        h = jnp.tanh(
            jnp.dot(w, h.astype(cdt), preferred_element_type=jnp.float32) + b)

    # output layer + tanh
    b_out = bout_ref[...]
    y = jnp.tanh(
        jnp.dot(wout_ref[...], h.astype(cdt),
                preferred_element_type=jnp.float32) + b_out)
    oT_ref[...] = y.astype(oT_ref.dtype)


def ritznet_forward(x, params, *, tile_n=256, use_bf16=False):
    """x: (N, d) float32. params: PyTorch-native (out, in) weights."""
    N, d = x.shape
    win, bin_ = params["win"], params["bin"]          # (width, d), (width,)
    wh, bh = params["wh"], params["bh"]               # (depth, w, w), (depth, w)
    wout, bout = params["wout"], params["bout"]       # (dd, width), (dd,)
    depth, width, _ = wh.shape
    dd = wout.shape[0]

    # padded sizes: features on sublanes (8), batch on lanes (128-multiples)
    d_pad = _round_up(d, 8)
    width_pad = _round_up(width, 128)
    n_pad = _round_up(N, tile_n)
    grid_n = n_pad // tile_n

    cdt = jnp.bfloat16 if use_bf16 else jnp.float32

    # ---- one-time padding / layout prep in the wrapper ---------------------
    # input, transposed so batch is the lane (last) dim
    xT = jnp.zeros((d_pad, n_pad), cdt).at[:d, :N].set(x.T.astype(cdt))

    # weights padded to (width_pad, ...); padded bias entries are 0 so padded
    # rows stay tanh(0) = 0 and contribute nothing downstream.
    win_p = jnp.zeros((width_pad, d_pad), cdt).at[:width, :d].set(
        win.astype(cdt))
    bin_p = jnp.zeros((width_pad, 1), jnp.float32).at[:width, 0].set(
        bin_.astype(jnp.float32))
    wh_p = jnp.zeros((depth, width_pad, width_pad), cdt).at[
        :, :width, :width].set(wh.astype(cdt))
    bh_p = jnp.zeros((depth, width_pad, 1), jnp.float32).at[
        :, :width, 0].set(bh.astype(jnp.float32))
    wout_p = jnp.zeros((dd, width_pad), cdt).at[:, :width].set(
        wout.astype(cdt))
    bout_p = bout.astype(jnp.float32).reshape(dd, 1)

    # ---- cost estimate for the XLA scheduler -------------------------------
    flops = 2 * n_pad * (d_pad * width_pad + depth * width_pad * width_pad
                         + width_pad * dd)
    transcendentals = n_pad * (width_pad * (depth + 1) + dd)
    bytes_accessed = sum(int(a.size) * a.dtype.itemsize
                         for a in (xT, win_p, bin_p, wh_p, bh_p, wout_p,
                                   bout_p)) + dd * n_pad * 4

    kernel = functools.partial(ritznet_kernel, depth=depth)

    oT = pl.pallas_call(
        kernel,
        out_shape=jax.ShapeDtypeStruct((dd, n_pad), jnp.float32),
        grid_spec=pltpu.PrefetchScalarGridSpec(
            num_scalar_prefetch=0,
            grid=(grid_n,),
            in_specs=[
                # batch tile of the (transposed) input: lane-dense
                pl.BlockSpec((d_pad, tile_n), lambda i: (0, i)),
                # weights / biases: full arrays, same block every grid step
                pl.BlockSpec((width_pad, d_pad), lambda i: (0, 0)),
                pl.BlockSpec((width_pad, 1), lambda i: (0, 0)),
                pl.BlockSpec((depth, width_pad, width_pad),
                             lambda i: (0, 0, 0)),
                pl.BlockSpec((depth, width_pad, 1), lambda i: (0, 0, 0)),
                pl.BlockSpec((dd, width_pad), lambda i: (0, 0)),
                pl.BlockSpec((dd, 1), lambda i: (0, 0)),
            ],
            out_specs=pl.BlockSpec((dd, tile_n), lambda i: (0, i)),
        ),
        compiler_params=pltpu.CompilerParams(
            dimension_semantics=("parallel",)),
        cost_estimate=pl.CostEstimate(
            flops=flops,
            transcendentals=transcendentals,
            bytes_accessed=bytes_accessed),
    )(xT, win_p, bin_p, wh_p, bh_p, wout_p, bout_p)

    # un-pad and return in the PyTorch (N, dd) orientation
    return oT[:, :N].T.astype(jnp.float32)


def init_params(key, d, width, depth, dd, dtype=jnp.float32):
    """PyTorch-style uniform(-1/sqrt(fan_in), 1/sqrt(fan_in)) init.

    Weights kept in PyTorch-native (out_features, in_features) layout."""
    keys = jax.random.split(key, 2 * (depth + 2))
    ki = iter(keys)

    def lin(fan_in, fan_out):
        bound = 1.0 / jnp.sqrt(jnp.float32(fan_in))
        w = jax.random.uniform(next(ki), (fan_out, fan_in), dtype,
                               minval=-bound, maxval=bound)
        b = jax.random.uniform(next(ki), (fan_out,), dtype,
                               minval=-bound, maxval=bound)
        return w, b

    win, bin_ = lin(d, width)
    wh_list, bh_list = [], []
    for _ in range(depth):
        w, b = lin(width, width)
        wh_list.append(w)
        bh_list.append(b)
    wout, bout = lin(width, dd)
    return {
        "win": win, "bin": bin_,
        "wh": jnp.stack(wh_list), "bh": jnp.stack(bh_list),
        "wout": wout, "bout": bout,
    }


def ritznet_reference(x, p):
    """Pure-JAX reference matching torch semantics: y = x @ W.T + b."""
    h = jnp.tanh(x @ p["win"].T + p["bin"])
    for i in range(p["wh"].shape[0]):
        h = jnp.tanh(h @ p["wh"][i].T + p["bh"][i])
    return jnp.tanh(h @ p["wout"].T + p["bout"])


if __name__ == "__main__":
    # RitzNet params = {'d': 4, 'width': 32, 'depth': 3, 'dd': 1};
    # batch N = 512 with tile_n = 256 -> 2 parallel grid steps (megacore).
    d, width, depth, dd = 4, 32, 3, 1
    N = 512
    tile_n = 256

    key = jax.random.PRNGKey(0)
    kx, kp = jax.random.split(key)
    x = jax.random.normal(kx, (N, d), dtype=jnp.float32)
    params = init_params(kp, d, width, depth, dd)

    ref = ritznet_reference(x, params)

    # f32 path (exactness check)
    out = jax.block_until_ready(ritznet_forward(x, params, tile_n=tile_n))
    assert out.shape == (N, dd)
    assert jnp.allclose(out, ref, atol=1e-5, rtol=1e-5)

    # bf16 MXU-input path (v6e/v7x-friendly; f32 accumulation + f32 tanh)
    out_bf16 = jax.block_until_ready(
        ritznet_forward(x, params, tile_n=tile_n, use_bf16=True))
    assert out_bf16.shape == (N, dd)
    assert jnp.allclose(out_bf16, ref, atol=5e-2, rtol=5e-2)

    print("KERNEL_OK")
</pallas_src>

<mosaic_0001>
module attributes {stable_mosaic.version = 11 : i64} {
  func.func @ritznet_kernel(%arg0: i32, %arg1: memref<8x256xf32, #tpu.memory_space<vmem>>, %arg2: memref<128x8xf32, #tpu.memory_space<vmem>>, %arg3: memref<128x1xf32, #tpu.memory_space<vmem>>, %arg4: memref<3x128x128xf32, #tpu.memory_space<vmem>>, %arg5: memref<3x128x1xf32, #tpu.memory_space<vmem>>, %arg6: memref<1x128xf32, #tpu.memory_space<vmem>>, %arg7: memref<1x1xf32, #tpu.memory_space<vmem>>, %arg8: memref<1x256xf32, #tpu.memory_space<vmem>>) attributes {dimension_semantics = [#tpu.dimension_semantics<parallel>], iteration_bounds = array<i64: 2>, scalar_prefetch = 0 : i64, scratch_operands = 0 : i64, tpu.core_type = #tpu.core_type<tc>, window_params = [{transform_indices = @transform_0, window_bounds = array<i64: 8, 256>}, {pipeline_mode = #tpu.pipeline_mode<synchronous>, transform_indices = @transform_1, window_bounds = array<i64: 128, 8>}, {pipeline_mode = #tpu.pipeline_mode<synchronous>, transform_indices = @transform_2, window_bounds = array<i64: 128, 1>}, {pipeline_mode = #tpu.pipeline_mode<synchronous>, transform_indices = @transform_3, window_bounds = array<i64: 3, 128, 128>}, {pipeline_mode = #tpu.pipeline_mode<synchronous>, transform_indices = @transform_4, window_bounds = array<i64: 3, 128, 1>}, {pipeline_mode = #tpu.pipeline_mode<synchronous>, transform_indices = @transform_5, window_bounds = array<i64: 1, 128>}, {pipeline_mode = #tpu.pipeline_mode<synchronous>, transform_indices = @transform_6, window_bounds = array<i64: 1, 1>}, {transform_indices = @transform_7, window_bounds = array<i64: 1, 256>}]} {
    %c0 = arith.constant 0 : index
    %c0_0 = arith.constant 0 : index
    %0 = vector.load %arg1[%c0, %c0_0] : memref<8x256xf32, #tpu.memory_space<vmem>>, vector<8x256xf32>
    %c0_1 = arith.constant 0 : index
    %c0_2 = arith.constant 0 : index
    %1 = vector.load %arg3[%c0_1, %c0_2] : memref<128x1xf32, #tpu.memory_space<vmem>>, vector<128x1xf32>
    %c0_3 = arith.constant 0 : index
    %c0_4 = arith.constant 0 : index
    %2 = vector.load %arg2[%c0_3, %c0_4] : memref<128x8xf32, #tpu.memory_space<vmem>>, vector<128x8xf32>
    %cst = arith.constant dense<0.000000e+00> : vector<128x256xf32>
    %3 = tpu.matmul %2, %0, %cst {dimension_numbers = #tpu.dot_dimension_numbers<[1], [0], [0], [1], [0, 0, 1, 1], [], []>} : vector<128x8xf32>, vector<8x256xf32>, vector<128x256xf32> -> vector<128x256xf32>
    %4 = vector.broadcast %1 : vector<128x1xf32> to vector<128x256xf32>
    %5 = arith.addf %3, %4 : vector<128x256xf32>
    %6 = math.tanh %5 : vector<128x256xf32>
    %c0_5 = arith.constant 0 : index
    %c0_6 = arith.constant 0 : index
    %c0_7 = arith.constant 0 : index
    %7 = vector.load %arg4[%c0_5, %c0_6, %c0_7] : memref<3x128x128xf32, #tpu.memory_space<vmem>>, vector<1x128x128xf32>
    %8 = vector.shape_cast %7 : vector<1x128x128xf32> to vector<128x128xf32>
    %c0_8 = arith.constant 0 : index
    %c0_9 = arith.constant 0 : index
    %c0_10 = arith.constant 0 : index
    %9 = vector.load %arg5[%c0_8, %c0_9, %c0_10] : memref<3x128x1xf32, #tpu.memory_space<vmem>>, vector<1x128x1xf32>
    %10 = vector.shape_cast %9 : vector<1x128x1xf32> to vector<128x1xf32>
    %cst_11 = arith.constant dense<0.000000e+00> : vector<128x256xf32>
    %11 = tpu.matmul %8, %6, %cst_11 {dimension_numbers = #tpu.dot_dimension_numbers<[1], [0], [0], [1], [0, 0, 1, 1], [], []>} : vector<128x128xf32>, vector<128x256xf32>, vector<128x256xf32> -> vector<128x256xf32>
    %12 = vector.broadcast %10 : vector<128x1xf32> to vector<128x256xf32>
    %13 = arith.addf %11, %12 : vector<128x256xf32>
    %14 = math.tanh %13 : vector<128x256xf32>
    %c1 = arith.constant 1 : index
    %c0_12 = arith.constant 0 : index
    %c0_13 = arith.constant 0 : index
    %15 = vector.load %arg4[%c1, %c0_12, %c0_13] : memref<3x128x128xf32, #tpu.memory_space<vmem>>, vector<1x128x128xf32>
    %16 = vector.shape_cast %15 : vector<1x128x128xf32> to vector<128x128xf32>
    %c1_14 = arith.constant 1 : index
    %c0_15 = arith.constant 0 : index
    %c0_16 = arith.constant 0 : index
    %17 = vector.load %arg5[%c1_14, %c0_15, %c0_16] : memref<3x128x1xf32, #tpu.memory_space<vmem>>, vector<1x128x1xf32>
    %18 = vector.shape_cast %17 : vector<1x128x1xf32> to vector<128x1xf32>
    %cst_17 = arith.constant dense<0.000000e+00> : vector<128x256xf32>
    %19 = tpu.matmul %16, %14, %cst_17 {dimension_numbers = #tpu.dot_dimension_numbers<[1], [0], [0], [1], [0, 0, 1, 1], [], []>} : vector<128x128xf32>, vector<128x256xf32>, vector<128x256xf32> -> vector<128x256xf32>
    %20 = vector.broadcast %18 : vector<128x1xf32> to vector<128x256xf32>
    %21 = arith.addf %19, %20 : vector<128x256xf32>
    %22 = math.tanh %21 : vector<128x256xf32>
    %c2 = arith.constant 2 : index
    %c0_18 = arith.constant 0 : index
    %c0_19 = arith.constant 0 : index
    %23 = vector.load %arg4[%c2, %c0_18, %c0_19] : memref<3x128x128xf32, #tpu.memory_space<vmem>>, vector<1x128x128xf32>
    %24 = vector.shape_cast %23 : vector<1x128x128xf32> to vector<128x128xf32>
    %c2_20 = arith.constant 2 : index
    %c0_21 = arith.constant 0 : index
    %c0_22 = arith.constant 0 : index
    %25 = vector.load %arg5[%c2_20, %c0_21, %c0_22] : memref<3x128x1xf32, #tpu.memory_space<vmem>>, vector<1x128x1xf32>
    %26 = vector.shape_cast %25 : vector<1x128x1xf32> to vector<128x1xf32>
    %cst_23 = arith.constant dense<0.000000e+00> : vector<128x256xf32>
    %27 = tpu.matmul %24, %22, %cst_23 {dimension_numbers = #tpu.dot_dimension_numbers<[1], [0], [0], [1], [0, 0, 1, 1], [], []>} : vector<128x128xf32>, vector<128x256xf32>, vector<128x256xf32> -> vector<128x256xf32>
    %28 = vector.broadcast %26 : vector<128x1xf32> to vector<128x256xf32>
    %29 = arith.addf %27, %28 : vector<128x256xf32>
    %30 = math.tanh %29 : vector<128x256xf32>
    %c0_24 = arith.constant 0 : index
    %c0_25 = arith.constant 0 : index
    %31 = vector.load %arg7[%c0_24, %c0_25] : memref<1x1xf32, #tpu.memory_space<vmem>>, vector<1x1xf32>
    %c0_26 = arith.constant 0 : index
    %c0_27 = arith.constant 0 : index
    %32 = vector.load %arg6[%c0_26, %c0_27] : memref<1x128xf32, #tpu.memory_space<vmem>>, vector<1x128xf32>
    %cst_28 = arith.constant dense<0.000000e+00> : vector<1x256xf32>
    %33 = tpu.matmul %32, %30, %cst_28 {dimension_numbers = #tpu.dot_dimension_numbers<[1], [0], [0], [1], [0, 0, 1, 1], [], []>} : vector<1x128xf32>, vector<128x256xf32>, vector<1x256xf32> -> vector<1x256xf32>
    %34 = vector.broadcast %31 : vector<1x1xf32> to vector<1x256xf32>
    %35 = arith.addf %33, %34 : vector<1x256xf32>
    %36 = math.tanh %35 : vector<1x256xf32>
    %c0_29 = arith.constant 0 : index
    %c0_30 = arith.constant 0 : index
    %37 = vector.load %arg8[%c0_29, %c0_30] : memref<1x256xf32, #tpu.memory_space<vmem>>, vector<1x256xf32>
    tpu.vector_store %arg8[%c0_29, %c0_30], %36 {strides = array<i32>} : memref<1x256xf32, #tpu.memory_space<vmem>>, vector<1x256xf32>,
    return
  }
  func.func @transform_0(%arg0: i32) -> (i32, i32) {
    %c0_i32 = arith.constant 0 : i32
    %c0_i32_0 = arith.constant 0 : i32
    return %c0_i32, %arg0 : i32, i32
  }
  func.func @transform_1(%arg0: i32) -> (i32, i32) {
    %c0_i32 = arith.constant 0 : i32
    %c0_i32_0 = arith.constant 0 : i32
    %c0_i32_1 = arith.constant 0 : i32
    return %c0_i32, %c0_i32_0 : i32, i32
  }
  func.func @transform_2(%arg0: i32) -> (i32, i32) {
    %c0_i32 = arith.constant 0 : i32
    %c0_i32_0 = arith.constant 0 : i32
    %c0_i32_1 = arith.constant 0 : i32
    return %c0_i32, %c0_i32_0 : i32, i32
  }
  func.func @transform_3(%arg0: i32) -> (i32, i32, i32) {
    %c0_i32 = arith.constant 0 : i32
    %c0_i32_0 = arith.constant 0 : i32
    %c0_i32_1 = arith.constant 0 : i32
    %c0_i32_2 = arith.constant 0 : i32
    return %c0_i32, %c0_i32_0, %c0_i32_1 : i32, i32, i32
  }
  func.func @transform_4(%arg0: i32) -> (i32, i32, i32) {
    %c0_i32 = arith.constant 0 : i32
    %c0_i32_0 = arith.constant 0 : i32
    %c0_i32_1 = arith.constant 0 : i32
    %c0_i32_2 = arith.constant 0 : i32
    return %c0_i32, %c0_i32_0, %c0_i32_1 : i32, i32, i32
  }
  func.func @transform_5(%arg0: i32) -> (i32, i32) {
    %c0_i32 = arith.constant 0 : i32
    %c0_i32_0 = arith.constant 0 : i32
    %c0_i32_1 = arith.constant 0 : i32
    return %c0_i32, %c0_i32_0 : i32, i32
  }
  func.func @transform_6(%arg0: i32) -> (i32, i32) {
    %c0_i32 = arith.constant 0 : i32
    %c0_i32_0 = arith.constant 0 : i32
    %c0_i32_1 = arith.constant 0 : i32
    return %c0_i32, %c0_i32_0 : i32, i32
  }
  func.func @transform_7(%arg0: i32) -> (i32, i32) {
    %c0_i32 = arith.constant 0 : i32
    %c0_i32_0 = arith.constant 0 : i32
    return %c0_i32, %arg0 : i32, i32
  }
}

</mosaic_0001>

<bundles_post_ra>
// kernel: tpu_custom_call.1
= control target key start
LH: loop header
LB: loop body
LE: loop exit
PB: predicated region body
PF: predicated region fallthrough
CT: control target
= control target key end

     0   :  { %s2941_s0 = inlined_call_operand.vmem [shape: f32[8,512], index: 0, kind: input, shape index: {}]   ;;  %s2942_s1 = inlined_call_operand.vmem [shape: f32[128,8], index: 1, kind: input, shape index: {}]   ;;  %s2943_s2 = inlined_call_operand.vmem [shape: f32[128,1], index: 2, kind: input, shape index: {}]   ;;  %s2944_s3 = inlined_call_operand.vmem [shape: f32[3,128,128], index: 3, kind: input, shape index: {}]   ;;  %s2945_s4 = inlined_call_operand.vmem [shape: f32[3,128,1], index: 4, kind: input, shape index: {}]   ;;  %s2946_s5 = inlined_call_operand.vmem [shape: f32[1,128], index: 5, kind: input, shape index: {}]   ;;  %s2947_s6 = inlined_call_operand.<no memory space> [shape: f32[1,1], index: 6, kind: input, shape index: {}]   ;;  %s2948_s7 = inlined_call_operand.hbm [shape: f32[1,512], index: 7, kind: output, shape index: {}]  }
   0x1   :  { %v12_v0 = vstv %s2947_s6 }
   0x2   :  { %13 = vst [vmem:[#allocation2] sm:$0x1] %v12_v0 }
   0x3   :  { %14 = vsyncpa [#allocation4], 0 }
   0x4   :  { %16 = vsyncpa [#allocation4 + $0x1], 0  ;;  %s2374_s26 = smov 0   ;;  %s2376_s27 = smov 0  }
   0x5   :  { %s2378_s28 = smov 0   ;;  %s2380_s29 = smov 0  }
   0x6 LB: > { %s2395_s6 = sadd.s32 4294967295, %s2325_s29   ;;  %s1738_s30 = sadd.s32 4294967294, %s2325_s29   ;;  %s2325_s29 = sphi %s2380_s29, %s2954_s29   ;;  %s2321_s28 = sphi %s2378_s28, %s2953_s28   ;;  %s2317_s27 = sphi %s2376_s27, %s2952_s27   ;;  %s2313_s26 = sphi %s2374_s26, %s2951_s26  }
   0x7   : > { %s2399_s8 = sadd.s32 1, %s2325_s29   ;;  %s181_s9 = sadd.s32 1, %s2321_s28 }
   0x8   : > { %s178_s10 = ssub.s32 %s2325_s29, %s2399_s8  ;;  %p191_p0 = scmp.ne.s32.totalorder %s2321_s28, %s2317_s27 }
   0x9   : > { %p179_p1 = scmp.eq.s32.totalorder %s178_s10, 0  ;;  %p192_p2 = scmp.eq.s32.totalorder %s2395_s6, 1 }
   0xa   : > { %p197_p3 = scmp.ne.s32.totalorder %s2317_s27, %s2313_s26  ;;  %p198_p4 = scmp.eq.s32.totalorder %s1738_s30, 1 }
   0xb   : > { %s2410_s11 = scalar_select %p179_p1, %s2321_s28, %s181_s9  }
   0xc   : > { %p2412_p5 = por %p192_p2, %p191_p0  ;;  %p2416_p6 = por %p198_p4, %p197_p3 }
   0xd   : > { %p1741_p7 = scmp.ge.s32.totalorder %s2325_s29, 1  ;;  %p243_p8 = scmp.lt.s32.totalorder %s2325_s29, 3 }
   0xf   : > { %p244_p9 = pnand %p1741_p7, %p243_p8 }
  0x10   : > { %v284_v1 = vld [vmem:[%s2943_s2] sm:$0xff] (!%p244_p9)  ;;  %v286_v2 = vld [vmem:[%s2943_s2 + $0x10] sm:$0xff] (!%p244_p9)  ;;  %s1743_s18 = sshll.u32 (!%p244_p9), %s2395_s6, 1  ;;  %v2327_v3 = vmov (!%p244_p9), 0   ;;  %v285_v4 = vld [vmem:[%s2943_s2 + $0x8] sm:$0xff] (!%p244_p9)  ;;  %v2328_v6 = vmov (!%p244_p9), 0.0  }
  0x11   : > { %247 = sbr.rel (%p244_p9) target bundleno = 1444 (0x5a4), region = 48  ;;  %2001 = vset.pattern.permute.xlu0 (!%p244_p9), %v2327_v3  ;;  %2002 = vset.pattern.permute.xlu1 (!%p244_p9), %v2327_v3  ;;  %p276_p10 = scmp.lt.s32.totalorder (!%p244_p9), %s1743_s18, 3  ;;  %v287_v5 = vld [vmem:[%s2943_s2 + $0x18] sm:$0xff] (!%p244_p9)  ;;  %v288_v7 = vld [vmem:[%s2943_s2 + $0x20] sm:$0xff] (!%p244_p9)  ;;  %vm396_vm0 = vcmask (!%p244_p9), 64512   ;;  %v289_v11 = vld [vmem:[%s2943_s2 + $0x28] sm:$0xff] (!%p244_p9) }
  0x12   : > { %318 = vperm.xlu0 (!%p244_p9), %2001, %v284_v1   ;;  %328 = vperm.xlu1 (!%p244_p9), %2002, %v286_v2   ;;  %v300_v10 = vld [vmem:[%s2942_s1] sm:$0xff] (!%p244_p9)  ;;  %v290_v12 = vld [vmem:[%s2943_s2 + $0x30] sm:$0xff] (!%p244_p9)  ;;  %v301_v13 = vld [vmem:[%s2942_s1 + $0x8] sm:$0xff] (!%p244_p9)  ;;  %s272_s22 = sand.u32 (!%p244_p9), 1, %s2317_s27   ;;  %s1830_s24 = sshll.u32 (!%p244_p9), %s2395_s6, 5 }
  0x13   : > { %509 = vmatprep.mubr.f32.mxu0 (!%p244_p9), %v2328_v6  ;;  %814 = vmatprep.mubr.f32.mxu1 (!%p244_p9), %v2328_v6  ;;  %v291_v14 = vld [vmem:[%s2943_s2 + $0x38] sm:$0xff] (!%p244_p9)  ;;  %v292_v15 = vld [vmem:[%s2943_s2 + $0x40] sm:$0xff] (!%p244_p9)  ;;  %v302_v16 = vld [vmem:[%s2942_s1 + $0x10] sm:$0xff] (!%p244_p9)  ;;  %s2899_s14 = scalar_lea.hbm (!%p244_p9), %s2948_s7, %s1830_s24  ;;  %s1665_s15 = scalar_lea.sflag (!%p244_p9), [#allocation4], %s272_s22 }
  0x14   : > { %v293_v17 = vld [vmem:[%s2943_s2 + $0x48] sm:$0xff] (!%p244_p9)  ;;  %v294_v18 = vld [vmem:[%s2943_s2 + $0x50] sm:$0xff] (!%p244_p9)  ;;  %v303_v19 = vld [vmem:[%s2942_s1 + $0x18] sm:$0xff] (!%p244_p9)  ;;  %s2330_s6 = smov (!%p244_p9), [#allocation3]  }
  0x15   : > { %v295_v20 = vld [vmem:[%s2943_s2 + $0x58] sm:$0xff] (!%p244_p9)  ;;  %v296_v21 = vld [vmem:[%s2943_s2 + $0x60] sm:$0xff] (!%p244_p9)  ;;  %v297_v23 = vld [vmem:[%s2943_s2 + $0x68] sm:$0xff] (!%p244_p9)  ;;  %s2267_s17 = sshll.u32 (!%p244_p9), %s2330_s6, 4  ;;  %s2268_s17 = int_to_ptr.vmem [resolvable:$false] %s2267_s17 }
  0x16   : > { %323 = vperm.xlu0 (!%p244_p9), %2001, %v285_v4   ;;  %333 = vperm.xlu1 (!%p244_p9), %2002, %v287_v5   ;;  %v304_v22 = vld [vmem:[%s2942_s1 + $0x20] sm:$0xff] (!%p244_p9)  ;;  %v298_v24 = vld [vmem:[%s2943_s2 + $0x70] sm:$0xff] (!%p244_p9)  ;;  %v305_v25 = vld [vmem:[%s2942_s1 + $0x28] sm:$0xff] (!%p244_p9) }
  0x17   : > { %v299_v26 = vld [vmem:[%s2943_s2 + $0x78] sm:$0xff] (!%p244_p9)  ;;  %v654_v27 = vld [vmem:[%s2945_s4] sm:$0xff] (!%p244_p9)  ;;  %v306_v28 = vld [vmem:[%s2942_s1 + $0x30] sm:$0xff] (!%p244_p9) }
  0x18   : > { %s2956_s18 = smov (!%p276_p10, %s1743_s18), 3  ;;  %v655_v29 = vld [vmem:[%s2945_s4 + $0x8] sm:$0xff]  ;;  %v656_v30 = vld [vmem:[%s2945_s4 + $0x10] sm:$0xff]  ;;  %v307_v31 = vld [vmem:[%s2942_s1 + $0x38] sm:$0xff] }
  0x19   : > { %s1744_s23 = sshll.u32 %s2956_s18, 3  ;;  %v657_v32 = vld [vmem:[%s2945_s4 + $0x18] sm:$0xff]  ;;  %v658_v33 = vld [vmem:[%s2945_s4 + $0x20] sm:$0xff]  ;;  %v659_v35 = vld [vmem:[%s2945_s4 + $0x28] sm:$0xff]  ;;  %s2269_s18 = scalar_lea.vmem %s2268_s17, 64 }
  0x1a   : > { %s279_s30 = scalar_lea.vmem %s2941_s0, %s1744_s23  ;;  %338 = vperm.xlu0 %2001, %v288_v7   ;;  %343 = vperm.xlu1 %2002, %v289_v11   ;;  %v308_v34 = vld [vmem:[%s2942_s1 + $0x40] sm:$0xff]  ;;  %v660_v36 = vld [vmem:[%s2945_s4 + $0x30] sm:$0xff]  ;;  %v309_v37 = vld [vmem:[%s2942_s1 + $0x48] sm:$0xff]  ;;  %s1742_s23 = sshll.u32 %s272_s22, 1 }
  0x1b   : > { %v283_v8 = vld [vmem:[%s279_s30 + $0x8] sm:$0xff]  ;;  %v282_v9 = vld [vmem:[%s279_s30] sm:$0xff]  ;;  %v661_v38 = vld [vmem:[%s2945_s4 + $0x38] sm:$0xff]  ;;  %s274_s25 = scalar_lea.vmem [#allocation3], %s1742_s23 }
  0x1c   : > { %445 = vmatprep.subr.mxu0 %v283_v8  ;;  %v662_v39 = vld [vmem:[%s2945_s4 + $0x40] sm:$0xff]  ;;  %v310_v40 = vld [vmem:[%s2942_s1 + $0x50] sm:$0xff]  ;;  %v663_v41 = vld [vmem:[%s2945_s4 + $0x48] sm:$0xff]  ;;  %s1679_s30 = sshll.u32 %s274_s25, 4  ;;  %s2901_s30 = int_to_ptr.vmem [resolvable:$true] %s1679_s30 }
  0x1d   : > { %446 = vmatpush1.msra.mxu0 %v282_v9  ;;  %v664_v42 = vld [vmem:[%s2945_s4 + $0x50] sm:$0xff]  ;;  %v311_v43 = vld [vmem:[%s2942_s1 + $0x58] sm:$0xff]  ;;  %v666_v45 = vld [vmem:[%s2945_s4 + $0x60] sm:$0xff]  ;;  %s2263_s16 = scalar_lea.vmem %s2901_s30, 32  ;;  %p2270_p0 = scmp.lt.s32.totalorder %s2901_s30, %s2268_s17 }
  0x1e   : > { %1745 = vmatmul.mubr.msk.f32.vlgmr.msra.gmra.mrb[0].mxu0 %vm396_vm0, %v300_v10  ;;  %348 = vperm.xlu0 %2001, %v290_v12   ;;  %v665_v44 = vld [vmem:[%s2945_s4 + $0x58] sm:$0xff]  ;;  %v312_v46 = vld [vmem:[%s2942_s1 + $0x60] sm:$0xff]  ;;  %v667_v47 = vld [vmem:[%s2945_s4 + $0x68] sm:$0xff]  ;;  %p2264_p11 = scmp.ne.s32.totalorder %s2901_s30, %s2263_s16  ;;  %p2271_p1 = scmp.lt.s32.totalorder %s2269_s18, %s2263_s16 }
  0x1f   : > { %515 = vmatprep.mubr.f32.mxu0 %v2328_v6  ;;  %353 = vperm.xlu1 %2002, %v291_v14   ;;  %v668_v48 = vld [vmem:[%s2945_s4 + $0x70] sm:$0xff]  ;;  %v313_v49 = vld [vmem:[%s2942_s1 + $0x68] sm:$0xff]  ;;  %v669_v50 = vld [vmem:[%s2945_s4 + $0x78] sm:$0xff] }
  0x20   : > { %v1777_v51 = vld [vmem:[%s2945_s4 + $0x80] sm:$0xff]  ;;  %v314_v52 = vld [vmem:[%s2942_s1 + $0x70] sm:$0xff]  ;;  %v1778_v53 = vld [vmem:[%s2945_s4 + $0x88] sm:$0xff]  ;;  %p2265_p12 = pnand %p2264_p11, %p2412_p5  ;;  %p2272_p2 = por %p2271_p1, %p2270_p0 }
  0x21   : > { %v1779_v54 = vld [vmem:[%s2945_s4 + $0x90] sm:$0xff]  ;;  %v315_v55 = vld [vmem:[%s2942_s1 + $0x78] sm:$0xff]  ;;  %v1781_v57 = vld [vmem:[%s2945_s4 + $0xa0] sm:$0xff] }
  0x22   : > { %1746 = vmatmul.mubr.msk.f32.gmra.mrb[2].mxu0 %vm396_vm0, %v301_v13  ;;  %358 = vperm.xlu0 %2001, %v292_v15   ;;  %v1780_v56 = vld [vmem:[%s2945_s4 + $0x98] sm:$0xff]  ;;  %v1782_v58 = vld [vmem:[%s2945_s4 + $0xa8] sm:$0xff]  ;;  %v1783_v59 = vld [vmem:[%s2945_s4 + $0xb0] sm:$0xff]  ;;  %p2266_p13 = pneg %p2265_p12 }
  0x23   : > { %521 = vmatprep.mubr.f32.mxu0 %v2328_v6  ;;  %363 = vperm.xlu1 %2002, %v293_v17   ;;  %v1784_v60 = vld [vmem:[%s2945_s4 + $0xb8] sm:$0xff]  ;;  %v1785_v61 = vld [vmem:[%s2945_s4 + $0xc0] sm:$0xff]  ;;  %v1786_v62 = vld [vmem:[%s2945_s4 + $0xc8] sm:$0xff] }
  0x24   : > { %v1787_v63 = vld [vmem:[%s2945_s4 + $0xd0] sm:$0xff]  ;;  %v1788_v0 = vld [vmem:[%s2945_s4 + $0xd8] sm:$0xff]  ;;  %v1789_v1 = vld [vmem:[%s2945_s4 + $0xe0] sm:$0xff]  ;;  %p2273_p3 = pnand %p2272_p2, %p2266_p13 }
  0x25   : > { %v1790_v2 = vld [vmem:[%s2945_s4 + $0xe8] sm:$0xff]  ;;  %v1791_v3 = vld [vmem:[%s2945_s4 + $0xf0] sm:$0xff]  ;;  %v1792_v4 = vld [vmem:[%s2945_s4 + $0xf8] sm:$0xff] }
  0x26   : > { %1747 = vmatmul.mubr.msk.f32.gmra.mrb[4].mxu0 %vm396_vm0, %v302_v16  ;;  %368 = vperm.xlu0 %2001, %v294_v18   ;;  %v1809_v5 = vld [vmem:[%s2945_s4 + $0x100] sm:$0xff]  ;;  %v1810_v7 = vld [vmem:[%s2945_s4 + $0x108] sm:$0xff]  ;;  %v1811_v8 = vld [vmem:[%s2945_s4 + $0x110] sm:$0xff] }
  0x27   : > { %527 = vmatprep.mubr.f32.mxu0 %v2328_v6  ;;  %373 = vperm.xlu1 %2002, %v295_v20   ;;  %v1812_v9 = vld [vmem:[%s2945_s4 + $0x118] sm:$0xff]  ;;  %v1813_v10 = vld [vmem:[%s2945_s4 + $0x120] sm:$0xff]  ;;  %v1814_v11 = vld [vmem:[%s2945_s4 + $0x128] sm:$0xff] }
  0x28   : > { %v1815_v12 = vld [vmem:[%s2945_s4 + $0x130] sm:$0xff]  ;;  %v1816_v13 = vld [vmem:[%s2945_s4 + $0x138] sm:$0xff]  ;;  %v1817_v14 = vld [vmem:[%s2945_s4 + $0x140] sm:$0xff] }
  0x29   : > { %v1818_v15 = vld [vmem:[%s2945_s4 + $0x148] sm:$0xff]  ;;  %v1819_v16 = vld [vmem:[%s2945_s4 + $0x150] sm:$0xff]  ;;  %v1820_v17 = vld [vmem:[%s2945_s4 + $0x158] sm:$0xff] }
  0x2a   : > { %1748 = vmatmul.mubr.msk.f32.gmra.mrb[6].mxu0 %vm396_vm0, %v303_v19  ;;  %378 = vperm.xlu0 %2001, %v296_v21   ;;  %v1821_v18 = vld [vmem:[%s2945_s4 + $0x160] sm:$0xff]  ;;  %v1822_v19 = vld [vmem:[%s2945_s4 + $0x168] sm:$0xff]  ;;  %v1823_v20 = vld [vmem:[%s2945_s4 + $0x170] sm:$0xff] }
  0x2b   : > { %533 = vmatprep.mubr.f32.mxu0 %v2328_v6  ;;  %383 = vperm.xlu1 %2002, %v297_v23   ;;  %v1824_v21 = vld [vmem:[%s2945_s4 + $0x178] sm:$0xff] }
  0x2e   : > { %1749 = vmatmul.mubr.msk.f32.gmra.mrb[8].mxu0 %vm396_vm0, %v304_v22  ;;  %388 = vperm.xlu0 %2001, %v298_v24   ;;  %v1557_v22 = vld [vmem:[#allocation2] sm:$0x1] }
  0x2f   : > { %539 = vmatprep.mubr.f32.mxu0 %v2328_v6  ;;  %393 = vperm.xlu1 %2002, %v299_v26  }
  0x32   : > { %1750 = vmatmul.mubr.msk.f32.gmra.mrb[10].mxu0 %vm396_vm0, %v305_v25  ;;  %672 = vperm.xlu0 %2001, %v654_v27  }
  0x33   : > { %545 = vmatprep.mubr.f32.mxu0 %v2328_v6  ;;  %677 = vperm.xlu1 %2002, %v655_v29  }
  0x36   : > { %1751 = vmatmul.mubr.msk.f32.gmra.mrb[12].mxu0 %vm396_vm0, %v306_v28  ;;  %682 = vperm.xlu0 %2001, %v656_v30  }
  0x37   : > { %551 = vmatprep.mubr.f32.mxu0 %v2328_v6  ;;  %687 = vperm.xlu1 %2002, %v657_v32  }
  0x3a   : > { %1752 = vmatmul.mubr.msk.f32.gmra.mrb[14].mxu0 %vm396_vm0, %v307_v31  ;;  %692 = vperm.xlu0 %2001, %v658_v33  }
  0x3b   : > { %557 = vmatprep.mubr.f32.mxu0 %v2328_v6  ;;  %697 = vperm.xlu1 %2002, %v659_v35  }
  0x3e   : > { %1753 = vmatmul.mubr.msk.f32.gmra.mrb[16].mxu0 %vm396_vm0, %v308_v34  ;;  %702 = vperm.xlu0 %2001, %v660_v36  }
  0x3f   : > { %563 = vmatprep.mubr.f32.mxu0 %v2328_v6  ;;  %707 = vperm.xlu1 %2002, %v661_v38  }
  0x42   : > { %1754 = vmatmul.mubr.msk.f32.gmra.mrb[18].mxu0 %vm396_vm0, %v309_v37  ;;  %712 = vperm.xlu0 %2001, %v662_v39  }
  0x43   : > { %569 = vmatprep.mubr.f32.mxu0 %v2328_v6  ;;  %717 = vperm.xlu1 %2002, %v663_v41  }
  0x46   : > { %1755 = vmatmul.mubr.msk.f32.gmra.mrb[20].mxu0 %vm396_vm0, %v310_v40  ;;  %722 = vperm.xlu0 %2001, %v664_v42  }
  0x47   : > { %575 = vmatprep.mubr.f32.mxu0 %v2328_v6  ;;  %727 = vperm.xlu1 %2002, %v665_v44  }
  0x4a   : > { %1756 = vmatmul.mubr.msk.f32.gmra.mrb[22].mxu0 %vm396_vm0, %v311_v43  ;;  %732 = vperm.xlu0 %2001, %v666_v45  }
  0x4b   : > { %581 = vmatprep.mubr.f32.mxu0 %v2328_v6  ;;  %737 = vperm.xlu1 %2002, %v667_v47  }
  0x4e   : > { %1757 = vmatmul.mubr.msk.f32.gmra.mrb[24].mxu0 %vm396_vm0, %v312_v46  ;;  %742 = vperm.xlu0 %2001, %v668_v48  }
  0x4f   : > { %587 = vmatprep.mubr.f32.mxu0 %v2328_v6  ;;  %747 = vperm.xlu1 %2002, %v669_v50  }
  0x52   : > { %1758 = vmatmul.mubr.msk.f32.gmra.mrb[26].mxu0 %vm396_vm0, %v313_v49  ;;  %979 = vperm.xlu0 %2001, %v1777_v51  }
  0x53   : > { %593 = vmatprep.mubr.f32.mxu0 %v2328_v6  ;;  %984 = vperm.xlu1 %2002, %v1778_v53  }
  0x56   : > { %1759 = vmatmul.mubr.msk.f32.gmra.mrb[28].mxu0 %vm396_vm0, %v314_v52  ;;  %989 = vperm.xlu0 %2001, %v1779_v54  }
  0x57   : > { %599 = vmatprep.mubr.f32.mxu0 %v2328_v6  ;;  %994 = vperm.xlu1 %2002, %v1780_v56  }
  0x5a   : > { %1760 = vmatmul.mubr.msk.f32.gmra.mrb[30].mxu0 %vm396_vm0, %v315_v55  ;;  %999 = vperm.xlu0 %2001, %v1781_v57  }
  0x5b   : > { %1121 = vmatprep.mubr.f32.mxu0 %v2328_v6  ;;  %1004 = vperm.xlu1 %2002, %v1782_v58  }
  0x5e   : > { %1009 = vperm.xlu0 %2001, %v1783_v59  }
  0x5f   : > { %1014 = vperm.xlu1 %2002, %v1784_v60  }
  0x62   : > { %1019 = vperm.xlu0 %2001, %v1785_v61  }
  0x63   : > { %1024 = vperm.xlu1 %2002, %v1786_v62  }
  0x66   : > { %1029 = vperm.xlu0 %2001, %v1787_v63  }
  0x67   : > { %1034 = vperm.xlu1 %2002, %v1788_v0  }
  0x6a   : > { %1039 = vperm.xlu0 %2001, %v1789_v1  }
  0x6b   : > { %1044 = vperm.xlu1 %2002, %v1790_v2  }
  0x6e   : > { %1049 = vperm.xlu0 %2001, %v1791_v3  }
  0x6f   : > { %1054 = vperm.xlu1 %2002, %v1792_v4  }
  0x72   : > { %1286 = vperm.xlu0 %2001, %v1809_v5  }
  0x73   : > { %1291 = vperm.xlu1 %2002, %v1810_v7  }
  0x76   : > { %1296 = vperm.xlu0 %2001, %v1811_v8  }
  0x77   : > { %1301 = vperm.xlu1 %2002, %v1812_v9  }
  0x7a   : > { %1306 = vperm.xlu0 %2001, %v1813_v10  }
  0x7b   : > { %1311 = vperm.xlu1 %2002, %v1814_v11  }
  0x7e   : > { %1316 = vperm.xlu0 %2001, %v1815_v12  }
  0x7f   : > { %1321 = vperm.xlu1 %2002, %v1816_v13  }
  0x82   : > { %1326 = vperm.xlu0 %2001, %v1817_v14  }
  0x83   : > { %1331 = vperm.xlu1 %2002, %v1818_v15  }
  0x86   : > { %1336 = vperm.xlu0 %2001, %v1819_v16  }
  0x87   : > { %1341 = vperm.xlu1 %2002, %v1820_v17  }
  0x8a   : > { %1346 = vperm.xlu0 %2001, %v1821_v18  }
  0x8b   : > { %1351 = vperm.xlu1 %2002, %v1822_v19  }
  0x8e   : > { %1356 = vperm.xlu0 %2001, %v1823_v20  }
  0x8f   : > { %1361 = vperm.xlu1 %2002, %v1824_v21  }
  0x91   : > { %v319_v23 = vpop.permute.xlu0 %318  ;;  %v329_v32 = vpop.permute.xlu1 %328 }
  0x92   : > { %1561 = vperm.xlu0 %2001, %v1557_v22  }
  0x95   : > { %v324_v28 = vpop.permute.xlu0 %323  ;;  %v334_v38 = vpop.permute.xlu1 %333 }
  0x99   : > { %v339_v45 = vpop.permute.xlu0 %338  ;;  %v344_v54 = vpop.permute.xlu1 %343 }
  0x9d   : > { %v349_v61 = vpop.permute.xlu0 %348 }
  0x9e   : > { %v354_v7 = vpop.permute.xlu1 %353 }
  0xa1   : > { %v359_v14 = vpop.permute.xlu0 %358 }
  0xf1   : > { %v511_v24 = vpop.f32.mrb[0].mxu0 }
  0xf2   : > { %v512_v25 = vadd.f32 %v511_v24, %v319_v23  ;;  %v513_v26 = vpop.f32.mrb[1].mxu0 }
  0xf3   : > { %v514_v27 = vadd.f32 %v513_v26, %v319_v23  ;;  %v364_v23 = vpop.permute.xlu1 %363 }
  0xf4   : > { %2003 = vtanh.f32 %v512_v25 }
  0xf5   : > { %v517_v29 = vpop.f32.mrb[2].mxu0  ;;  %2005 = vtanh.f32 %v514_v27 }
  0xf6   : > { %v518_v30 = vadd.f32 %v517_v29, %v324_v28  ;;  %v519_v31 = vpop.f32.mrb[3].mxu0 }
  0xf7   : > { %v520_v33 = vadd.f32 %v519_v31, %v324_v28 }
  0xf8   : > { %2007 = vtanh.f32 %v518_v30  ;;  %v369_v30 = vpop.permute.xlu0 %368 }
  0xf9   : > { %2009 = vtanh.f32 %v520_v33  ;;  %v523_v34 = vpop.f32.mrb[4].mxu0 }
  0xfa   : > { %v524_v35 = vadd.f32 %v523_v34, %v329_v32  ;;  %v525_v36 = vpop.f32.mrb[5].mxu0 }
  0xfb   : > { %v526_v37 = vadd.f32 %v525_v36, %v329_v32 }
  0xfc   : > { %2011 = vtanh.f32 %v524_v35 }
  0xfd   : > { %v529_v39 = vpop.f32.mrb[6].mxu0  ;;  %2013 = vtanh.f32 %v526_v37 }
  0xfe   : > { %v530_v40 = vadd.f32 %v529_v39, %v334_v38  ;;  %v531_v41 = vpop.f32.mrb[7].mxu0  ;;  %v2004_v43 = vpop.eup %2003 }
  0xff   : > { %v532_v42 = vadd.f32 %v531_v41, %v334_v38  ;;  %v2006_v44 = vpop.eup %2005  ;;  %v374_v39 = vpop.permute.xlu1 %373 }
 0x100   : > { %2015 = vtanh.f32 %v530_v40 }
 0x101   : > { %2017 = vtanh.f32 %v532_v42  ;;  %v535_v46 = vpop.f32.mrb[8].mxu0 }
 0x102   : > { %v2008_v47 = vpop.eup %2007  ;;  %v536_v48 = vadd.f32 %v535_v46, %v339_v45  ;;  %v537_v49 = vpop.f32.mrb[9].mxu0 }
 0x103   : > { %v2010_v50 = vpop.eup %2009  ;;  %v538_v51 = vadd.f32 %v537_v49, %v339_v45  ;;  %v1833_v52 = vpack.c.bf16 %v2008_v47, %v2004_v43  ;;  %v379_v46 = vpop.permute.xlu0 %378 }
 0x104   : > { %v1831_v53 = vpack.c.bf16 %v2010_v50, %v2006_v44  ;;  %2019 = vtanh.f32 %v536_v48 }
 0x105   : > { %v541_v55 = vpop.f32.mrb[10].mxu0  ;;  %2021 = vtanh.f32 %v538_v51 }
 0x106   : > { %v542_v56 = vadd.f32 %v541_v55, %v344_v54  ;;  %v543_v57 = vpop.f32.mrb[11].mxu0  ;;  %1832 = vmatprep.subr.bf16.mxu1 %v1831_v53  ;;  %v2012_v59 = vpop.eup %2011 }
 0x107   : > { %v544_v58 = vadd.f32 %v543_v57, %v344_v54  ;;  %1834 = vmatpush1.bf16.msra.mxu1 %v1833_v52  ;;  %v2014_v60 = vpop.eup %2013  ;;  %v384_v55 = vpop.permute.xlu1 %383 }
 0x108   : > { %2023 = vtanh.f32 %v542_v56 }
 0x109   : > { %2025 = vtanh.f32 %v544_v58  ;;  %v547_v62 = vpop.f32.mrb[12].mxu0 }
 0x10a   : > { %v2016_v63 = vpop.eup %2015  ;;  %v548_v0 = vadd.f32 %v547_v62, %v349_v61  ;;  %v549_v1 = vpop.f32.mrb[13].mxu0 }
 0x10b   : > { %v2018_v2 = vpop.eup %2017  ;;  %v550_v3 = vadd.f32 %v549_v1, %v349_v61  ;;  %v1837_v4 = vpack.c.bf16 %v2016_v63, %v2012_v59  ;;  %v389_v62 = vpop.permute.xlu0 %388 }
 0x10c   : > { %v1835_v5 = vpack.c.bf16 %v2018_v2, %v2014_v60  ;;  %2027 = vtanh.f32 %v548_v0 }
 0x10d   : > { %v553_v8 = vpop.f32.mrb[14].mxu0  ;;  %2029 = vtanh.f32 %v550_v3 }
 0x10e   : > { %v554_v9 = vadd.f32 %v553_v8, %v354_v7  ;;  %v555_v10 = vpop.f32.mrb[15].mxu0  ;;  %1836 = vmatprep.subr.bf16.mxu1 %v1835_v5  ;;  %v2020_v12 = vpop.eup %2019 }
 0x10f   : > { %v556_v11 = vadd.f32 %v555_v10, %v354_v7  ;;  %1838 = vmatpush1.bf16.msra.mxu1 %v1837_v4  ;;  %v2022_v13 = vpop.eup %2021  ;;  %v394_v8 = vpop.permute.xlu1 %393 }
 0x110   : > { %2031 = vtanh.f32 %v554_v9 }
 0x111   : > { %2033 = vtanh.f32 %v556_v11  ;;  %v559_v15 = vpop.f32.mrb[16].mxu0 }
 0x112   : > { %v2024_v16 = vpop.eup %2023  ;;  %v560_v17 = vadd.f32 %v559_v15, %v359_v14  ;;  %v561_v18 = vpop.f32.mrb[17].mxu0 }
 0x113   : > { %v2026_v19 = vpop.eup %2025  ;;  %v562_v20 = vadd.f32 %v561_v18, %v359_v14  ;;  %v1841_v21 = vpack.c.bf16 %v2024_v16, %v2020_v12 }
 0x114   : > { %v1839_v22 = vpack.c.bf16 %v2026_v19, %v2022_v13  ;;  %2035 = vtanh.f32 %v560_v17 }
 0x115   : > { %v565_v24 = vpop.f32.mrb[18].mxu0  ;;  %2037 = vtanh.f32 %v562_v20 }
 0x116   : > { %v566_v25 = vadd.f32 %v565_v24, %v364_v23  ;;  %v567_v26 = vpop.f32.mrb[19].mxu0  ;;  %1840 = vmatprep.subr.bf16.mxu1 %v1839_v22  ;;  %v2028_v28 = vpop.eup %2027 }
 0x117   : > { %v568_v27 = vadd.f32 %v567_v26, %v364_v23  ;;  %1842 = vmatpush1.bf16.msra.mxu1 %v1841_v21  ;;  %v2030_v29 = vpop.eup %2029  ;;  %v639_v26 = vld [vmem:[%s2944_s3 + $0x8] sm:$0xff] }
 0x118   : > { %2039 = vtanh.f32 %v566_v25  ;;  %v638_v25 = vld [vmem:[%s2944_s3] sm:$0xff] }
 0x119   : > { %2041 = vtanh.f32 %v568_v27  ;;  %v571_v31 = vpop.f32.mrb[20].mxu0  ;;  %v640_v27 = vld [vmem:[%s2944_s3 + $0x10] sm:$0xff] }
 0x11a   : > { %v2032_v32 = vpop.eup %2031  ;;  %v572_v33 = vadd.f32 %v571_v31, %v369_v30  ;;  %v573_v34 = vpop.f32.mrb[21].mxu0  ;;  %v644_v31 = vld [vmem:[%s2944_s3 + $0x30] sm:$0xff] }
 0x11b   : > { %v2034_v35 = vpop.eup %2033  ;;  %v574_v36 = vadd.f32 %v573_v34, %v369_v30  ;;  %v1845_v37 = vpack.c.bf16 %v2032_v32, %v2028_v28  ;;  %v641_v28 = vld [vmem:[%s2944_s3 + $0x18] sm:$0xff]  ;;  %v643_v30 = vld [vmem:[%s2944_s3 + $0x28] sm:$0xff] }
 0x11c   : > { %v1843_v38 = vpack.c.bf16 %v2034_v35, %v2030_v29  ;;  %2043 = vtanh.f32 %v572_v33  ;;  %v642_v29 = vld [vmem:[%s2944_s3 + $0x20] sm:$0xff]  ;;  %v645_v32 = vld [vmem:[%s2944_s3 + $0x38] sm:$0xff]  ;;  %v647_v34 = vld [vmem:[%s2944_s3 + $0x48] sm:$0xff] }
 0x11d   : > { %v577_v40 = vpop.f32.mrb[22].mxu0  ;;  %2045 = vtanh.f32 %v574_v36  ;;  %v646_v33 = vld [vmem:[%s2944_s3 + $0x40] sm:$0xff]  ;;  %v648_v35 = vld [vmem:[%s2944_s3 + $0x50] sm:$0xff]  ;;  %v649_v36 = vld [vmem:[%s2944_s3 + $0x58] sm:$0xff] }
 0x11e   : > { %v578_v41 = vadd.f32 %v577_v40, %v374_v39  ;;  %v579_v42 = vpop.f32.mrb[23].mxu0  ;;  %1844 = vmatprep.subr.bf16.mxu1 %v1843_v38  ;;  %v2036_v44 = vpop.eup %2035  ;;  %v651_v38 = vld [vmem:[%s2944_s3 + $0x68] sm:$0xff]  ;;  %v653_v40 = vld [vmem:[%s2944_s3 + $0x78] sm:$0xff] }
 0x11f   : > { %v580_v43 = vadd.f32 %v579_v42, %v374_v39  ;;  %1846 = vmatpush1.bf16.msra.mxu1 %v1845_v37  ;;  %v2038_v45 = vpop.eup %2037  ;;  %v650_v37 = vld [vmem:[%s2944_s3 + $0x60] sm:$0xff]  ;;  %v652_v39 = vld [vmem:[%s2944_s3 + $0x70] sm:$0xff] }
 0x120   : > { %2047 = vtanh.f32 %v578_v41  ;;  %v673_v41 = vpop.permute.xlu0 %672 }
 0x121   : > { %2049 = vtanh.f32 %v580_v43  ;;  %v583_v47 = vpop.f32.mrb[24].mxu0 }
 0x122   : > { %v2040_v48 = vpop.eup %2039  ;;  %v584_v49 = vadd.f32 %v583_v47, %v379_v46  ;;  %v585_v50 = vpop.f32.mrb[25].mxu0 }
 0x123   : > { %v2042_v51 = vpop.eup %2041  ;;  %v586_v52 = vadd.f32 %v585_v50, %v379_v46  ;;  %v1849_v53 = vpack.c.bf16 %v2040_v48, %v2036_v44  ;;  %v678_v46 = vpop.permute.xlu1 %677 }
 0x124   : > { %v1847_v54 = vpack.c.bf16 %v2042_v51, %v2038_v45  ;;  %2051 = vtanh.f32 %v584_v49  ;;  %v683_v51 = vpop.permute.xlu0 %682 }
 0x125   : > { %v589_v56 = vpop.f32.mrb[26].mxu0  ;;  %2053 = vtanh.f32 %v586_v52 }
 0x126   : > { %v590_v57 = vadd.f32 %v589_v56, %v384_v55  ;;  %v591_v58 = vpop.f32.mrb[27].mxu0  ;;  %1848 = vmatprep.subr.bf16.mxu1 %v1847_v54  ;;  %v2044_v60 = vpop.eup %2043 }
 0x127   : > { %v592_v59 = vadd.f32 %v591_v58, %v384_v55  ;;  %1850 = vmatpush1.bf16.msra.mxu1 %v1849_v53  ;;  %v2046_v61 = vpop.eup %2045  ;;  %v688_v56 = vpop.permute.xlu1 %687 }
 0x128   : > { %2055 = vtanh.f32 %v590_v57 }
 0x129   : > { %2057 = vtanh.f32 %v592_v59  ;;  %v595_v63 = vpop.f32.mrb[28].mxu0 }
 0x12a   : > { %v2048_v0 = vpop.eup %2047  ;;  %v596_v1 = vadd.f32 %v595_v63, %v389_v62  ;;  %v597_v2 = vpop.f32.mrb[29].mxu0 }
 0x12b   : > { %v2050_v3 = vpop.eup %2049  ;;  %v598_v4 = vadd.f32 %v597_v2, %v389_v62  ;;  %v1853_v5 = vpack.c.bf16 %v2048_v0, %v2044_v60  ;;  %v693_v63 = vpop.permute.xlu0 %692 }
 0x12c   : > { %v1851_v7 = vpack.c.bf16 %v2050_v3, %v2046_v61  ;;  %2059 = vtanh.f32 %v596_v1 }
 0x12d   : > { %v601_v9 = vpop.f32.mrb[30].mxu0  ;;  %2061 = vtanh.f32 %v598_v4 }
 0x12e   : > { %v602_v10 = vadd.f32 %v601_v9, %v394_v8  ;;  %v603_v11 = vpop.f32.mrb[31].mxu0  ;;  %1852 = vmatprep.subr.bf16.mxu1 %v1851_v7  ;;  %v2052_v13 = vpop.eup %2051 }
 0x12f   : > { %v604_v12 = vadd.f32 %v603_v11, %v394_v8  ;;  %1854 = vmatpush1.bf16.msra.mxu1 %v1853_v5  ;;  %v2054_v14 = vpop.eup %2053  ;;  %v698_v9 = vpop.permute.xlu1 %697 }
 0x130   : > { %2063 = vtanh.f32 %v602_v10 }
 0x131   : > { %2065 = vtanh.f32 %v604_v12 }
 0x132   : > { %v2056_v15 = vpop.eup %2055 }
 0x133   : > { %v2058_v16 = vpop.eup %2057  ;;  %v1857_v17 = vpack.c.bf16 %v2056_v15, %v2052_v13 }
 0x134   : > { %v1855_v18 = vpack.c.bf16 %v2058_v16, %v2054_v14  ;;  %v703_v16 = vpop.permute.xlu0 %702 }
 0x136   : > { %1856 = vmatprep.subr.bf16.mxu1 %v1855_v18  ;;  %v2060_v19 = vpop.eup %2059 }
 0x137   : > { %1858 = vmatpush1.bf16.msra.mxu1 %v1857_v17  ;;  %v2062_v20 = vpop.eup %2061 }
 0x13a   : > { %v2064_v21 = vpop.eup %2063 }
 0x13b   : > { %v2066_v22 = vpop.eup %2065  ;;  %v1861_v23 = vpack.c.bf16 %v2064_v21, %v2060_v19 }
 0x13c   : > { %v1859_v24 = vpack.c.bf16 %v2066_v22, %v2062_v20 }
 0x13e   : > { %1860 = vmatprep.subr.bf16.mxu1 %v1859_v24 }
 0x13f   : > { %1862 = vmatpush1.bf16.msra.mxu1 %v1861_v23 }
 0x142   : > { %815 = vmatmul.mubr.f32.vlgmr.msra.gmra.mrb[0].mxu1 %v638_v25  ;;  %v708_v25 = vpop.permute.xlu1 %707 }
 0x143   : > { %820 = vmatprep.mubr.f32.mxu1 %v2328_v6 }
 0x146   : > { %821 = vmatmul.mubr.f32.gmra.mrb[2].mxu1 %v639_v26 }
 0x147   : > { %826 = vmatprep.mubr.f32.mxu1 %v2328_v6 }
 0x14a   : > { %827 = vmatmul.mubr.f32.gmra.mrb[4].mxu1 %v640_v27 }
 0x14b   : > { %832 = vmatprep.mubr.f32.mxu1 %v2328_v6 }
 0x14e   : > { %833 = vmatmul.mubr.f32.gmra.mrb[6].mxu1 %v641_v28 }
 0x14f   : > { %838 = vmatprep.mubr.f32.mxu1 %v2328_v6 }
 0x152   : > { %839 = vmatmul.mubr.f32.gmra.mrb[8].mxu1 %v642_v29 }
 0x153   : > { %844 = vmatprep.mubr.f32.mxu1 %v2328_v6 }
 0x156   : > { %845 = vmatmul.mubr.f32.gmra.mrb[10].mxu1 %v643_v30 }
 0x157   : > { %850 = vmatprep.mubr.f32.mxu1 %v2328_v6 }
 0x15a   : > { %851 = vmatmul.mubr.f32.gmra.mrb[12].mxu1 %v644_v31 }
 0x15b   : > { %856 = vmatprep.mubr.f32.mxu1 %v2328_v6 }
 0x15e   : > { %857 = vmatmul.mubr.f32.gmra.mrb[14].mxu1 %v645_v32  ;;  %v713_v32 = vpop.permute.xlu0 %712 }
 0x15f   : > { %862 = vmatprep.mubr.f32.mxu1 %v2328_v6 }
 0x162   : > { %863 = vmatmul.mubr.f32.gmra.mrb[16].mxu1 %v646_v33 }
 0x163   : > { %868 = vmatprep.mubr.f32.mxu1 %v2328_v6 }
 0x166   : > { %869 = vmatmul.mubr.f32.gmra.mrb[18].mxu1 %v647_v34 }
 0x167   : > { %874 = vmatprep.mubr.f32.mxu1 %v2328_v6 }
 0x16a   : > { %875 = vmatmul.mubr.f32.gmra.mrb[20].mxu1 %v648_v35 }
 0x16b   : > { %880 = vmatprep.mubr.f32.mxu1 %v2328_v6 }
 0x16e   : > { %881 = vmatmul.mubr.f32.gmra.mrb[22].mxu1 %v649_v36 }
 0x16f   : > { %886 = vmatprep.mubr.f32.mxu1 %v2328_v6 }
 0x172   : > { %887 = vmatmul.mubr.f32.gmra.mrb[24].mxu1 %v650_v37 }
 0x173   : > { %892 = vmatprep.mubr.f32.mxu1 %v2328_v6 }
 0x176   : > { %893 = vmatmul.mubr.f32.gmra.mrb[26].mxu1 %v651_v38 }
 0x177   : > { %898 = vmatprep.mubr.f32.mxu1 %v2328_v6 }
 0x17a   : > { %899 = vmatmul.mubr.f32.gmra.mrb[28].mxu1 %v652_v39 }
 0x17b   : > { %904 = vmatprep.mubr.f32.mxu1 %v2328_v6 }
 0x17e   : > { %905 = vmatmul.mubr.f32.gmra.mrb[30].mxu1 %v653_v40 }
 0x17f   : > { %1428 = vmatprep.mubr.f32.mxu1 %v2328_v6 }
 0x215   : > { %v816_v42 = vpop.f32.mrb[0].mxu1 }
 0x216   : > { %v817_v43 = vadd.f32 %v816_v42, %v673_v41  ;;  %v818_v44 = vpop.f32.mrb[1].mxu1 }
 0x217   : > { %v819_v45 = vadd.f32 %v818_v44, %v673_v41  ;;  %v718_v41 = vpop.permute.xlu1 %717 }
 0x218   : > { %2067 = vtanh.f32 %v817_v43 }
 0x219   : > { %v822_v47 = vpop.f32.mrb[2].mxu1  ;;  %2069 = vtanh.f32 %v819_v45 }
 0x21a   : > { %v823_v48 = vadd.f32 %v822_v47, %v678_v46  ;;  %v824_v49 = vpop.f32.mrb[3].mxu1 }
 0x21b   : > { %v825_v50 = vadd.f32 %v824_v49, %v678_v46 }
 0x21c   : > { %2071 = vtanh.f32 %v823_v48  ;;  %v723_v48 = vpop.permute.xlu0 %722 }
 0x21d   : > { %2073 = vtanh.f32 %v825_v50  ;;  %v828_v52 = vpop.f32.mrb[4].mxu1 }
 0x21e   : > { %v829_v53 = vadd.f32 %v828_v52, %v683_v51  ;;  %v830_v54 = vpop.f32.mrb[5].mxu1 }
 0x21f   : > { %v831_v55 = vadd.f32 %v830_v54, %v683_v51 }
 0x220   : > { %2075 = vtanh.f32 %v829_v53 }
 0x221   : > { %v834_v57 = vpop.f32.mrb[6].mxu1  ;;  %2077 = vtanh.f32 %v831_v55 }
 0x222   : > { %v835_v58 = vadd.f32 %v834_v57, %v688_v56  ;;  %v836_v59 = vpop.f32.mrb[7].mxu1  ;;  %v2068_v61 = vpop.eup %2067 }
 0x223   : > { %v837_v60 = vadd.f32 %v836_v59, %v688_v56  ;;  %v2070_v62 = vpop.eup %2069  ;;  %v728_v57 = vpop.permute.xlu1 %727 }
 0x224   : > { %2079 = vtanh.f32 %v835_v58 }
 0x225   : > { %2081 = vtanh.f32 %v837_v60  ;;  %v840_v0 = vpop.f32.mrb[8].mxu1 }
 0x226   : > { %v2072_v1 = vpop.eup %2071  ;;  %v841_v2 = vadd.f32 %v840_v0, %v693_v63  ;;  %v842_v3 = vpop.f32.mrb[9].mxu1 }
 0x227   : > { %v2074_v4 = vpop.eup %2073  ;;  %v843_v5 = vadd.f32 %v842_v3, %v693_v63  ;;  %v1865_v7 = vpack.c.bf16 %v2072_v1, %v2068_v61  ;;  %v733_v0 = vpop.permute.xlu0 %732 }
 0x228   : > { %v1863_v8 = vpack.c.bf16 %v2074_v4, %v2070_v62  ;;  %2083 = vtanh.f32 %v841_v2 }
 0x229   : > { %v846_v10 = vpop.f32.mrb[10].mxu1  ;;  %2085 = vtanh.f32 %v843_v5 }
 0x22a   : > { %v847_v11 = vadd.f32 %v846_v10, %v698_v9  ;;  %v848_v12 = vpop.f32.mrb[11].mxu1  ;;  %1864 = vmatprep.subr.bf16.mxu0 %v1863_v8  ;;  %v2076_v14 = vpop.eup %2075 }
 0x22b   : > { %v849_v13 = vadd.f32 %v848_v12, %v698_v9  ;;  %1866 = vmatpush1.bf16.msra.mxu0 %v1865_v7  ;;  %v2078_v15 = vpop.eup %2077  ;;  %v738_v10 = vpop.permute.xlu1 %737 }
 0x22c   : > { %2087 = vtanh.f32 %v847_v11 }
 0x22d   : > { %2089 = vtanh.f32 %v849_v13  ;;  %v852_v17 = vpop.f32.mrb[12].mxu1 }
 0x22e   : > { %v2080_v18 = vpop.eup %2079  ;;  %v853_v19 = vadd.f32 %v852_v17, %v703_v16  ;;  %v854_v20 = vpop.f32.mrb[13].mxu1 }
 0x22f   : > { %v2082_v21 = vpop.eup %2081  ;;  %v855_v22 = vadd.f32 %v854_v20, %v703_v16  ;;  %v1869_v23 = vpack.c.bf16 %v2080_v18, %v2076_v14  ;;  %v743_v17 = vpop.permute.xlu0 %742 }
 0x230   : > { %v1867_v24 = vpack.c.bf16 %v2082_v21, %v2078_v15  ;;  %2091 = vtanh.f32 %v853_v19 }
 0x231   : > { %v858_v26 = vpop.f32.mrb[14].mxu1  ;;  %2093 = vtanh.f32 %v855_v22 }
 0x232   : > { %v859_v27 = vadd.f32 %v858_v26, %v708_v25  ;;  %v860_v28 = vpop.f32.mrb[15].mxu1  ;;  %1868 = vmatprep.subr.bf16.mxu0 %v1867_v24  ;;  %v2084_v30 = vpop.eup %2083 }
 0x233   : > { %v861_v29 = vadd.f32 %v860_v28, %v708_v25  ;;  %1870 = vmatpush1.bf16.msra.mxu0 %v1869_v23  ;;  %v2086_v31 = vpop.eup %2085  ;;  %v748_v26 = vpop.permute.xlu1 %747 }
 0x234   : > { %2095 = vtanh.f32 %v859_v27 }
 0x235   : > { %2097 = vtanh.f32 %v861_v29  ;;  %v864_v33 = vpop.f32.mrb[16].mxu1 }
 0x236   : > { %v2088_v34 = vpop.eup %2087  ;;  %v865_v35 = vadd.f32 %v864_v33, %v713_v32  ;;  %v866_v36 = vpop.f32.mrb[17].mxu1 }
 0x237   : > { %v2090_v37 = vpop.eup %2089  ;;  %v867_v38 = vadd.f32 %v866_v36, %v713_v32  ;;  %v1873_v39 = vpack.c.bf16 %v2088_v34, %v2084_v30 }
 0x238   : > { %v1871_v40 = vpack.c.bf16 %v2090_v37, %v2086_v31  ;;  %2099 = vtanh.f32 %v865_v35 }
 0x239   : > { %v870_v42 = vpop.f32.mrb[18].mxu1  ;;  %2101 = vtanh.f32 %v867_v38 }
 0x23a   : > { %v871_v43 = vadd.f32 %v870_v42, %v718_v41  ;;  %v872_v44 = vpop.f32.mrb[19].mxu1  ;;  %1872 = vmatprep.subr.bf16.mxu0 %v1871_v40  ;;  %v2092_v46 = vpop.eup %2091 }
 0x23b   : > { %v873_v45 = vadd.f32 %v872_v44, %v718_v41  ;;  %1874 = vmatpush1.bf16.msra.mxu0 %v1873_v39  ;;  %v2094_v47 = vpop.eup %2093  ;;  %v1762_v44 = vld [vmem:[%s2944_s3 + $0x88] sm:$0xff] }
 0x23c   : > { %2103 = vtanh.f32 %v871_v43  ;;  %v1761_v43 = vld [vmem:[%s2944_s3 + $0x80] sm:$0xff] }
 0x23d   : > { %2105 = vtanh.f32 %v873_v45  ;;  %v876_v49 = vpop.f32.mrb[20].mxu1  ;;  %v1763_v45 = vld [vmem:[%s2944_s3 + $0x90] sm:$0xff] }
 0x23e   : > { %v2096_v50 = vpop.eup %2095  ;;  %v877_v51 = vadd.f32 %v876_v49, %v723_v48  ;;  %v878_v52 = vpop.f32.mrb[21].mxu1  ;;  %v1767_v49 = vld [vmem:[%s2944_s3 + $0xb0] sm:$0xff] }
 0x23f   : > { %v2098_v53 = vpop.eup %2097  ;;  %v879_v54 = vadd.f32 %v878_v52, %v723_v48  ;;  %v1877_v55 = vpack.c.bf16 %v2096_v50, %v2092_v46  ;;  %v1764_v46 = vld [vmem:[%s2944_s3 + $0x98] sm:$0xff]  ;;  %v1766_v48 = vld [vmem:[%s2944_s3 + $0xa8] sm:$0xff] }
 0x240   : > { %v1875_v56 = vpack.c.bf16 %v2098_v53, %v2094_v47  ;;  %2107 = vtanh.f32 %v877_v51  ;;  %v1765_v47 = vld [vmem:[%s2944_s3 + $0xa0] sm:$0xff]  ;;  %v1768_v50 = vld [vmem:[%s2944_s3 + $0xb8] sm:$0xff]  ;;  %v1770_v52 = vld [vmem:[%s2944_s3 + $0xc8] sm:$0xff] }
 0x241   : > { %v882_v58 = vpop.f32.mrb[22].mxu1  ;;  %2109 = vtanh.f32 %v879_v54  ;;  %v1769_v51 = vld [vmem:[%s2944_s3 + $0xc0] sm:$0xff]  ;;  %v1771_v53 = vld [vmem:[%s2944_s3 + $0xd0] sm:$0xff]  ;;  %v1772_v54 = vld [vmem:[%s2944_s3 + $0xd8] sm:$0xff] }
 0x242   : > { %v883_v59 = vadd.f32 %v882_v58, %v728_v57  ;;  %v884_v60 = vpop.f32.mrb[23].mxu1  ;;  %1876 = vmatprep.subr.bf16.mxu0 %v1875_v56  ;;  %v2100_v62 = vpop.eup %2099  ;;  %v1774_v56 = vld [vmem:[%s2944_s3 + $0xe8] sm:$0xff]  ;;  %v1776_v58 = vld [vmem:[%s2944_s3 + $0xf8] sm:$0xff] }
 0x243   : > { %v885_v61 = vadd.f32 %v884_v60, %v728_v57  ;;  %1878 = vmatpush1.bf16.msra.mxu0 %v1877_v55  ;;  %v2102_v63 = vpop.eup %2101  ;;  %v1773_v55 = vld [vmem:[%s2944_s3 + $0xe0] sm:$0xff]  ;;  %v1775_v57 = vld [vmem:[%s2944_s3 + $0xf0] sm:$0xff] }
 0x244   : > { %2111 = vtanh.f32 %v883_v59  ;;  %v980_v59 = vpop.permute.xlu0 %979 }
 0x245   : > { %2113 = vtanh.f32 %v885_v61  ;;  %v888_v1 = vpop.f32.mrb[24].mxu1 }
 0x246   : > { %v2104_v2 = vpop.eup %2103  ;;  %v889_v3 = vadd.f32 %v888_v1, %v733_v0  ;;  %v890_v4 = vpop.f32.mrb[25].mxu1 }
 0x247   : > { %v2106_v5 = vpop.eup %2105  ;;  %v891_v7 = vadd.f32 %v890_v4, %v733_v0  ;;  %v1881_v8 = vpack.c.bf16 %v2104_v2, %v2100_v62  ;;  %v985_v0 = vpop.permute.xlu1 %984 }
 0x248   : > { %v1879_v9 = vpack.c.bf16 %v2106_v5, %v2102_v63  ;;  %2115 = vtanh.f32 %v889_v3  ;;  %v990_v5 = vpop.permute.xlu0 %989 }
 0x249   : > { %v894_v11 = vpop.f32.mrb[26].mxu1  ;;  %2117 = vtanh.f32 %v891_v7 }
 0x24a   : > { %v895_v12 = vadd.f32 %v894_v11, %v738_v10  ;;  %v896_v13 = vpop.f32.mrb[27].mxu1  ;;  %1880 = vmatprep.subr.bf16.mxu0 %v1879_v9  ;;  %v2108_v15 = vpop.eup %2107 }
 0x24b   : > { %v897_v14 = vadd.f32 %v896_v13, %v738_v10  ;;  %1882 = vmatpush1.bf16.msra.mxu0 %v1881_v8  ;;  %v2110_v16 = vpop.eup %2109  ;;  %v995_v11 = vpop.permute.xlu1 %994 }
 0x24c   : > { %2119 = vtanh.f32 %v895_v12 }
 0x24d   : > { %2121 = vtanh.f32 %v897_v14  ;;  %v900_v18 = vpop.f32.mrb[28].mxu1 }
 0x24e   : > { %v2112_v19 = vpop.eup %2111  ;;  %v901_v20 = vadd.f32 %v900_v18, %v743_v17  ;;  %v902_v21 = vpop.f32.mrb[29].mxu1 }
 0x24f   : > { %v2114_v22 = vpop.eup %2113  ;;  %v903_v23 = vadd.f32 %v902_v21, %v743_v17  ;;  %v1885_v24 = vpack.c.bf16 %v2112_v19, %v2108_v15  ;;  %v1000_v18 = vpop.permute.xlu0 %999 }
 0x250   : > { %v1883_v25 = vpack.c.bf16 %v2114_v22, %v2110_v16  ;;  %2123 = vtanh.f32 %v901_v20 }
 0x251   : > { %v906_v27 = vpop.f32.mrb[30].mxu1  ;;  %2125 = vtanh.f32 %v903_v23 }
 0x252   : > { %v907_v28 = vadd.f32 %v906_v27, %v748_v26  ;;  %v908_v29 = vpop.f32.mrb[31].mxu1  ;;  %1884 = vmatprep.subr.bf16.mxu0 %v1883_v25  ;;  %v2116_v31 = vpop.eup %2115 }
 0x253   : > { %v909_v30 = vadd.f32 %v908_v29, %v748_v26  ;;  %1886 = vmatpush1.bf16.msra.mxu0 %v1885_v24  ;;  %v2118_v32 = vpop.eup %2117  ;;  %v1005_v27 = vpop.permute.xlu1 %1004 }
 0x254   : > { %2127 = vtanh.f32 %v907_v28 }
 0x255   : > { %2129 = vtanh.f32 %v909_v30 }
 0x256   : > { %v2120_v33 = vpop.eup %2119 }
 0x257   : > { %v2122_v34 = vpop.eup %2121  ;;  %v1889_v35 = vpack.c.bf16 %v2120_v33, %v2116_v31 }
 0x258   : > { %v1887_v36 = vpack.c.bf16 %v2122_v34, %v2118_v32  ;;  %v1010_v34 = vpop.permute.xlu0 %1009 }
 0x25a   : > { %1888 = vmatprep.subr.bf16.mxu0 %v1887_v36  ;;  %v2124_v37 = vpop.eup %2123 }
 0x25b   : > { %1890 = vmatpush1.bf16.msra.mxu0 %v1889_v35  ;;  %v2126_v38 = vpop.eup %2125 }
 0x25e   : > { %v2128_v39 = vpop.eup %2127 }
 0x25f   : > { %v2130_v40 = vpop.eup %2129  ;;  %v1893_v41 = vpack.c.bf16 %v2128_v39, %v2124_v37 }
 0x260   : > { %v1891_v42 = vpack.c.bf16 %v2130_v40, %v2126_v38 }
 0x262   : > { %1892 = vmatprep.subr.bf16.mxu0 %v1891_v42 }
 0x263   : > { %1894 = vmatpush1.bf16.msra.mxu0 %v1893_v41 }
 0x266   : > { %1122 = vmatmul.mubr.f32.vlgmr.msra.gmra.mrb[32].mxu0 %v1761_v43  ;;  %v1015_v43 = vpop.permute.xlu1 %1014 }
 0x267   : > { %1127 = vmatprep.mubr.f32.mxu0 %v2328_v6 }
 0x26a   : > { %1128 = vmatmul.mubr.f32.gmra.mrb[34].mxu0 %v1762_v44 }
 0x26b   : > { %1133 = vmatprep.mubr.f32.mxu0 %v2328_v6 }
 0x26e   : > { %1134 = vmatmul.mubr.f32.gmra.mrb[36].mxu0 %v1763_v45 }
 0x26f   : > { %1139 = vmatprep.mubr.f32.mxu0 %v2328_v6 }
 0x272   : > { %1140 = vmatmul.mubr.f32.gmra.mrb[38].mxu0 %v1764_v46 }
 0x273   : > { %1145 = vmatprep.mubr.f32.mxu0 %v2328_v6 }
 0x276   : > { %1146 = vmatmul.mubr.f32.gmra.mrb[40].mxu0 %v1765_v47 }
 0x277   : > { %1151 = vmatprep.mubr.f32.mxu0 %v2328_v6 }
 0x27a   : > { %1152 = vmatmul.mubr.f32.gmra.mrb[42].mxu0 %v1766_v48 }
 0x27b   : > { %1157 = vmatprep.mubr.f32.mxu0 %v2328_v6 }
 0x27e   : > { %1158 = vmatmul.mubr.f32.gmra.mrb[44].mxu0 %v1767_v49 }
 0x27f   : > { %1163 = vmatprep.mubr.f32.mxu0 %v2328_v6 }
 0x282   : > { %1164 = vmatmul.mubr.f32.gmra.mrb[46].mxu0 %v1768_v50  ;;  %v1020_v50 = vpop.permute.xlu0 %1019 }
 0x283   : > { %1169 = vmatprep.mubr.f32.mxu0 %v2328_v6 }
 0x286   : > { %1170 = vmatmul.mubr.f32.gmra.mrb[48].mxu0 %v1769_v51 }
 0x287   : > { %1175 = vmatprep.mubr.f32.mxu0 %v2328_v6 }
 0x28a   : > { %1176 = vmatmul.mubr.f32.gmra.mrb[50].mxu0 %v1770_v52 }
 0x28b   : > { %1181 = vmatprep.mubr.f32.mxu0 %v2328_v6 }
 0x28e   : > { %1182 = vmatmul.mubr.f32.gmra.mrb[52].mxu0 %v1771_v53 }
 0x28f   : > { %1187 = vmatprep.mubr.f32.mxu0 %v2328_v6 }
 0x292   : > { %1188 = vmatmul.mubr.f32.gmra.mrb[54].mxu0 %v1772_v54 }
 0x293   : > { %1193 = vmatprep.mubr.f32.mxu0 %v2328_v6 }
 0x296   : > { %1194 = vmatmul.mubr.f32.gmra.mrb[56].mxu0 %v1773_v55 }
 0x297   : > { %1199 = vmatprep.mubr.f32.mxu0 %v2328_v6 }
 0x29a   : > { %1200 = vmatmul.mubr.f32.gmra.mrb[58].mxu0 %v1774_v56 }
 0x29b   : > { %1205 = vmatprep.mubr.f32.mxu0 %v2328_v6 }
 0x29e   : > { %1206 = vmatmul.mubr.f32.gmra.mrb[60].mxu0 %v1775_v57 }
 0x29f   : > { %1211 = vmatprep.mubr.f32.mxu0 %v2328_v6 }
 0x2a2   : > { %1212 = vmatmul.mubr.f32.gmra.mrb[62].mxu0 %v1776_v58 }
 0x2a3   : > { %1632 = vmatprep.mubr.f32.mxu0 %v2328_v6 }
 0x339   : > { %v1123_v60 = vpop.f32.mrb[32].mxu0 }
 0x33a   : > { %v1124_v61 = vadd.f32 %v1123_v60, %v980_v59  ;;  %v1125_v62 = vpop.f32.mrb[33].mxu0 }
 0x33b   : > { %v1126_v63 = vadd.f32 %v1125_v62, %v980_v59  ;;  %v1025_v59 = vpop.permute.xlu1 %1024 }
 0x33c   : > { %2131 = vtanh.f32 %v1124_v61 }
 0x33d   : > { %v1129_v1 = vpop.f32.mrb[34].mxu0  ;;  %2133 = vtanh.f32 %v1126_v63 }
 0x33e   : > { %v1130_v2 = vadd.f32 %v1129_v1, %v985_v0  ;;  %v1131_v3 = vpop.f32.mrb[35].mxu0 }
 0x33f   : > { %v1132_v4 = vadd.f32 %v1131_v3, %v985_v0 }
 0x340   : > { %2135 = vtanh.f32 %v1130_v2  ;;  %v1030_v2 = vpop.permute.xlu0 %1029 }
 0x341   : > { %2137 = vtanh.f32 %v1132_v4  ;;  %v1135_v7 = vpop.f32.mrb[36].mxu0 }
 0x342   : > { %v1136_v8 = vadd.f32 %v1135_v7, %v990_v5  ;;  %v1137_v9 = vpop.f32.mrb[37].mxu0 }
 0x343   : > { %v1138_v10 = vadd.f32 %v1137_v9, %v990_v5 }
 0x344   : > { %2139 = vtanh.f32 %v1136_v8 }
 0x345   : > { %v1141_v12 = vpop.f32.mrb[38].mxu0  ;;  %2141 = vtanh.f32 %v1138_v10 }
 0x346   : > { %v1142_v13 = vadd.f32 %v1141_v12, %v995_v11  ;;  %v1143_v14 = vpop.f32.mrb[39].mxu0  ;;  %v2132_v16 = vpop.eup %2131 }
 0x347   : > { %v1144_v15 = vadd.f32 %v1143_v14, %v995_v11  ;;  %v2134_v17 = vpop.eup %2133  ;;  %v1035_v12 = vpop.permute.xlu1 %1034 }
 0x348   : > { %2143 = vtanh.f32 %v1142_v13 }
 0x349   : > { %2145 = vtanh.f32 %v1144_v15  ;;  %v1147_v19 = vpop.f32.mrb[40].mxu0 }
 0x34a   : > { %v2136_v20 = vpop.eup %2135  ;;  %v1148_v21 = vadd.f32 %v1147_v19, %v1000_v18  ;;  %v1149_v22 = vpop.f32.mrb[41].mxu0 }
 0x34b   : > { %v2138_v23 = vpop.eup %2137  ;;  %v1150_v24 = vadd.f32 %v1149_v22, %v1000_v18  ;;  %v1897_v25 = vpack.c.bf16 %v2136_v20, %v2132_v16  ;;  %v1040_v19 = vpop.permute.xlu0 %1039 }
 0x34c   : > { %v1895_v26 = vpack.c.bf16 %v2138_v23, %v2134_v17  ;;  %2147 = vtanh.f32 %v1148_v21 }
 0x34d   : > { %v1153_v28 = vpop.f32.mrb[42].mxu0  ;;  %2149 = vtanh.f32 %v1150_v24 }
 0x34e   : > { %v1154_v29 = vadd.f32 %v1153_v28, %v1005_v27  ;;  %v1155_v30 = vpop.f32.mrb[43].mxu0  ;;  %1896 = vmatprep.subr.bf16.mxu1 %v1895_v26  ;;  %v2140_v32 = vpop.eup %2139 }
 0x34f   : > { %v1156_v31 = vadd.f32 %v1155_v30, %v1005_v27  ;;  %1898 = vmatpush1.bf16.msra.mxu1 %v1897_v25  ;;  %v2142_v33 = vpop.eup %2141  ;;  %v1045_v28 = vpop.permute.xlu1 %1044 }
 0x350   : > { %2151 = vtanh.f32 %v1154_v29 }
 0x351   : > { %2153 = vtanh.f32 %v1156_v31  ;;  %v1159_v35 = vpop.f32.mrb[44].mxu0 }
 0x352   : > { %v2144_v36 = vpop.eup %2143  ;;  %v1160_v37 = vadd.f32 %v1159_v35, %v1010_v34  ;;  %v1161_v38 = vpop.f32.mrb[45].mxu0 }
 0x353   : > { %v2146_v39 = vpop.eup %2145  ;;  %v1162_v40 = vadd.f32 %v1161_v38, %v1010_v34  ;;  %v1901_v41 = vpack.c.bf16 %v2144_v36, %v2140_v32  ;;  %v1050_v35 = vpop.permute.xlu0 %1049 }
 0x354   : > { %v1899_v42 = vpack.c.bf16 %v2146_v39, %v2142_v33  ;;  %2155 = vtanh.f32 %v1160_v37 }
 0x355   : > { %v1165_v44 = vpop.f32.mrb[46].mxu0  ;;  %2157 = vtanh.f32 %v1162_v40 }
 0x356   : > { %v1166_v45 = vadd.f32 %v1165_v44, %v1015_v43  ;;  %v1167_v46 = vpop.f32.mrb[47].mxu0  ;;  %1900 = vmatprep.subr.bf16.mxu1 %v1899_v42  ;;  %v2148_v48 = vpop.eup %2147 }
 0x357   : > { %v1168_v47 = vadd.f32 %v1167_v46, %v1015_v43  ;;  %1902 = vmatpush1.bf16.msra.mxu1 %v1901_v41  ;;  %v2150_v49 = vpop.eup %2149  ;;  %v1055_v44 = vpop.permute.xlu1 %1054 }
 0x358   : > { %2159 = vtanh.f32 %v1166_v45 }
 0x359   : > { %2161 = vtanh.f32 %v1168_v47  ;;  %v1171_v51 = vpop.f32.mrb[48].mxu0 }
 0x35a   : > { %v2152_v52 = vpop.eup %2151  ;;  %v1172_v53 = vadd.f32 %v1171_v51, %v1020_v50  ;;  %v1173_v54 = vpop.f32.mrb[49].mxu0 }
 0x35b   : > { %v2154_v55 = vpop.eup %2153  ;;  %v1174_v56 = vadd.f32 %v1173_v54, %v1020_v50  ;;  %v1905_v57 = vpack.c.bf16 %v2152_v52, %v2148_v48 }
 0x35c   : > { %v1903_v58 = vpack.c.bf16 %v2154_v55, %v2150_v49  ;;  %2163 = vtanh.f32 %v1172_v53 }
 0x35d   : > { %v1177_v60 = vpop.f32.mrb[50].mxu0  ;;  %2165 = vtanh.f32 %v1174_v56 }
 0x35e   : > { %v1178_v61 = vadd.f32 %v1177_v60, %v1025_v59  ;;  %v1179_v62 = vpop.f32.mrb[51].mxu0  ;;  %1904 = vmatprep.subr.bf16.mxu1 %v1903_v58  ;;  %v2156_v0 = vpop.eup %2155 }
 0x35f   : > { %v1180_v63 = vadd.f32 %v1179_v62, %v1025_v59  ;;  %1906 = vmatpush1.bf16.msra.mxu1 %v1905_v57  ;;  %v2158_v1 = vpop.eup %2157  ;;  %v1794_v62 = vld [vmem:[%s2944_s3 + $0x108] sm:$0xff] }
 0x360   : > { %2167 = vtanh.f32 %v1178_v61  ;;  %v1793_v61 = vld [vmem:[%s2944_s3 + $0x100] sm:$0xff] }
 0x361   : > { %2169 = vtanh.f32 %v1180_v63  ;;  %v1183_v3 = vpop.f32.mrb[52].mxu0  ;;  %v1795_v63 = vld [vmem:[%s2944_s3 + $0x110] sm:$0xff] }
 0x362   : > { %v2160_v4 = vpop.eup %2159  ;;  %v1184_v5 = vadd.f32 %v1183_v3, %v1030_v2  ;;  %v1185_v7 = vpop.f32.mrb[53].mxu0  ;;  %v1799_v3 = vld [vmem:[%s2944_s3 + $0x130] sm:$0xff] }
 0x363   : > { %v2162_v8 = vpop.eup %2161  ;;  %v1186_v9 = vadd.f32 %v1185_v7, %v1030_v2  ;;  %v1909_v10 = vpack.c.bf16 %v2160_v4, %v2156_v0  ;;  %v1796_v0 = vld [vmem:[%s2944_s3 + $0x118] sm:$0xff]  ;;  %v1798_v2 = vld [vmem:[%s2944_s3 + $0x128] sm:$0xff] }
 0x364   : > { %v1907_v11 = vpack.c.bf16 %v2162_v8, %v2158_v1  ;;  %2171 = vtanh.f32 %v1184_v5  ;;  %v1797_v1 = vld [vmem:[%s2944_s3 + $0x120] sm:$0xff]  ;;  %v1800_v4 = vld [vmem:[%s2944_s3 + $0x138] sm:$0xff]  ;;  %v1802_v7 = vld [vmem:[%s2944_s3 + $0x148] sm:$0xff] }
 0x365   : > { %v1189_v13 = vpop.f32.mrb[54].mxu0  ;;  %2173 = vtanh.f32 %v1186_v9  ;;  %v1801_v5 = vld [vmem:[%s2944_s3 + $0x140] sm:$0xff]  ;;  %v1803_v8 = vld [vmem:[%s2944_s3 + $0x150] sm:$0xff]  ;;  %v1804_v9 = vld [vmem:[%s2944_s3 + $0x158] sm:$0xff] }
 0x366   : > { %v1190_v14 = vadd.f32 %v1189_v13, %v1035_v12  ;;  %v1191_v15 = vpop.f32.mrb[55].mxu0  ;;  %1908 = vmatprep.subr.bf16.mxu1 %v1907_v11  ;;  %v2164_v17 = vpop.eup %2163  ;;  %v1806_v11 = vld [vmem:[%s2944_s3 + $0x168] sm:$0xff]  ;;  %v1808_v13 = vld [vmem:[%s2944_s3 + $0x178] sm:$0xff] }
 0x367   : > { %v1192_v16 = vadd.f32 %v1191_v15, %v1035_v12  ;;  %1910 = vmatpush1.bf16.msra.mxu1 %v1909_v10  ;;  %v2166_v18 = vpop.eup %2165  ;;  %v1805_v10 = vld [vmem:[%s2944_s3 + $0x160] sm:$0xff]  ;;  %v1807_v12 = vld [vmem:[%s2944_s3 + $0x170] sm:$0xff] }
 0x368   : > { %2175 = vtanh.f32 %v1190_v14  ;;  %v1287_v14 = vpop.permute.xlu0 %1286 }
 0x369   : > { %2177 = vtanh.f32 %v1192_v16  ;;  %v1195_v20 = vpop.f32.mrb[56].mxu0 }
 0x36a   : > { %v2168_v21 = vpop.eup %2167  ;;  %v1196_v22 = vadd.f32 %v1195_v20, %v1040_v19  ;;  %v1197_v23 = vpop.f32.mrb[57].mxu0 }
 0x36b   : > { %v2170_v24 = vpop.eup %2169  ;;  %v1198_v25 = vadd.f32 %v1197_v23, %v1040_v19  ;;  %v1913_v26 = vpack.c.bf16 %v2168_v21, %v2164_v17  ;;  %v1292_v19 = vpop.permute.xlu1 %1291 }
 0x36c   : > { %v1911_v27 = vpack.c.bf16 %v2170_v24, %v2166_v18  ;;  %2179 = vtanh.f32 %v1196_v22  ;;  %v1297_v24 = vpop.permute.xlu0 %1296 }
 0x36d   : > { %v1201_v29 = vpop.f32.mrb[58].mxu0  ;;  %2181 = vtanh.f32 %v1198_v25 }
 0x36e   : > { %v1202_v30 = vadd.f32 %v1201_v29, %v1045_v28  ;;  %v1203_v31 = vpop.f32.mrb[59].mxu0  ;;  %1912 = vmatprep.subr.bf16.mxu1 %v1911_v27  ;;  %v2172_v33 = vpop.eup %2171 }
 0x36f   : > { %v1204_v32 = vadd.f32 %v1203_v31, %v1045_v28  ;;  %1914 = vmatpush1.bf16.msra.mxu1 %v1913_v26  ;;  %v2174_v34 = vpop.eup %2173  ;;  %v1302_v28 = vpop.permute.xlu1 %1301 }
 0x370   : > { %2183 = vtanh.f32 %v1202_v30 }
 0x371   : > { %2185 = vtanh.f32 %v1204_v32  ;;  %v1207_v36 = vpop.f32.mrb[60].mxu0 }
 0x372   : > { %v2176_v37 = vpop.eup %2175  ;;  %v1208_v38 = vadd.f32 %v1207_v36, %v1050_v35  ;;  %v1209_v39 = vpop.f32.mrb[61].mxu0 }
 0x373   : > { %v2178_v40 = vpop.eup %2177  ;;  %v1210_v41 = vadd.f32 %v1209_v39, %v1050_v35  ;;  %v1917_v42 = vpack.c.bf16 %v2176_v37, %v2172_v33  ;;  %v1307_v35 = vpop.permute.xlu0 %1306 }
 0x374   : > { %v1915_v43 = vpack.c.bf16 %v2178_v40, %v2174_v34  ;;  %2187 = vtanh.f32 %v1208_v38 }
 0x375   : > { %v1213_v45 = vpop.f32.mrb[62].mxu0  ;;  %2189 = vtanh.f32 %v1210_v41 }
 0x376   : > { %v1214_v46 = vadd.f32 %v1213_v45, %v1055_v44  ;;  %v1215_v47 = vpop.f32.mrb[63].mxu0  ;;  %1916 = vmatprep.subr.bf16.mxu1 %v1915_v43  ;;  %v2180_v49 = vpop.eup %2179 }
 0x377   : > { %v1216_v48 = vadd.f32 %v1215_v47, %v1055_v44  ;;  %1918 = vmatpush1.bf16.msra.mxu1 %v1917_v42  ;;  %v2182_v50 = vpop.eup %2181  ;;  %v1312_v44 = vpop.permute.xlu1 %1311 }
 0x378   : > { %2191 = vtanh.f32 %v1214_v46 }
 0x379   : > { %2193 = vtanh.f32 %v1216_v48 }
 0x37a   : > { %v2184_v51 = vpop.eup %2183 }
 0x37b   : > { %v2186_v52 = vpop.eup %2185  ;;  %v1921_v53 = vpack.c.bf16 %v2184_v51, %v2180_v49  ;;  %v1317_v51 = vpop.permute.xlu0 %1316 }
 0x37c   : > { %v1919_v54 = vpack.c.bf16 %v2186_v52, %v2182_v50 }
 0x37e   : > { %1920 = vmatprep.subr.bf16.mxu1 %v1919_v54  ;;  %v2188_v55 = vpop.eup %2187 }
 0x37f   : > { %1922 = vmatpush1.bf16.msra.mxu1 %v1921_v53  ;;  %v2190_v56 = vpop.eup %2189 }
 0x382   : > { %v2192_v57 = vpop.eup %2191 }
 0x383   : > { %v2194_v58 = vpop.eup %2193  ;;  %v1925_v59 = vpack.c.bf16 %v2192_v57, %v2188_v55 }
 0x384   : > { %v1923_v60 = vpack.c.bf16 %v2194_v58, %v2190_v56 }
 0x386   : > { %1924 = vmatprep.subr.bf16.mxu1 %v1923_v60  ;;  %v1322_v60 = vpop.permute.xlu1 %1321 }
 0x387   : > { %1926 = vmatpush1.bf16.msra.mxu1 %v1925_v59 }
 0x38a   : > { %1429 = vmatmul.mubr.f32.vlgmr.msra.gmra.mrb[32].mxu1 %v1793_v61 }
 0x38b   : > { %1434 = vmatprep.mubr.f32.mxu1 %v2328_v6 }
 0x38e   : > { %1435 = vmatmul.mubr.f32.gmra.mrb[34].mxu1 %v1794_v62 }
 0x38f   : > { %1440 = vmatprep.mubr.f32.mxu1 %v2328_v6 }
 0x392   : > { %1441 = vmatmul.mubr.f32.gmra.mrb[36].mxu1 %v1795_v63 }
 0x393   : > { %1446 = vmatprep.mubr.f32.mxu1 %v2328_v6 }
 0x396   : > { %1447 = vmatmul.mubr.f32.gmra.mrb[38].mxu1 %v1796_v0 }
 0x397   : > { %1452 = vmatprep.mubr.f32.mxu1 %v2328_v6 }
 0x39a   : > { %1453 = vmatmul.mubr.f32.gmra.mrb[40].mxu1 %v1797_v1 }
 0x39b   : > { %1458 = vmatprep.mubr.f32.mxu1 %v2328_v6 }
 0x39e   : > { %1459 = vmatmul.mubr.f32.gmra.mrb[42].mxu1 %v1798_v2 }
 0x39f   : > { %1464 = vmatprep.mubr.f32.mxu1 %v2328_v6 }
 0x3a2   : > { %1465 = vmatmul.mubr.f32.gmra.mrb[44].mxu1 %v1799_v3  ;;  %v1327_v3 = vpop.permute.xlu0 %1326 }
 0x3a3   : > { %1470 = vmatprep.mubr.f32.mxu1 %v2328_v6 }
 0x3a6   : > { %1471 = vmatmul.mubr.f32.gmra.mrb[46].mxu1 %v1800_v4 }
 0x3a7   : > { %1476 = vmatprep.mubr.f32.mxu1 %v2328_v6 }
 0x3aa   : > { %1477 = vmatmul.mubr.f32.gmra.mrb[48].mxu1 %v1801_v5 }
 0x3ab   : > { %1482 = vmatprep.mubr.f32.mxu1 %v2328_v6 }
 0x3ae   : > { %1483 = vmatmul.mubr.f32.gmra.mrb[50].mxu1 %v1802_v7 }
 0x3af   : > { %1488 = vmatprep.mubr.f32.mxu1 %v2328_v6 }
 0x3b2   : > { %1489 = vmatmul.mubr.f32.gmra.mrb[52].mxu1 %v1803_v8 }
 0x3b3   : > { %1494 = vmatprep.mubr.f32.mxu1 %v2328_v6 }
 0x3b6   : > { %1495 = vmatmul.mubr.f32.gmra.mrb[54].mxu1 %v1804_v9 }
 0x3b7   : > { %1500 = vmatprep.mubr.f32.mxu1 %v2328_v6 }
 0x3ba   : > { %1501 = vmatmul.mubr.f32.gmra.mrb[56].mxu1 %v1805_v10 }
 0x3bb   : > { %1506 = vmatprep.mubr.f32.mxu1 %v2328_v6 }
 0x3be   : > { %1507 = vmatmul.mubr.f32.gmra.mrb[58].mxu1 %v1806_v11 }
 0x3bf   : > { %1512 = vmatprep.mubr.f32.mxu1 %v2328_v6 }
 0x3c2   : > { %1513 = vmatmul.mubr.f32.gmra.mrb[60].mxu1 %v1807_v12 }
 0x3c3   : > { %1518 = vmatprep.mubr.f32.mxu1 %v2328_v6 }
 0x3c6   : > { %1519 = vmatmul.mubr.f32.gmra.mrb[62].mxu1 %v1808_v13  ;;  %v1332_v13 = vpop.permute.xlu1 %1331 }
 0x45d   : > { %v1430_v15 = vpop.f32.mrb[32].mxu1 }
 0x45e   : > { %v1431_v16 = vadd.f32 %v1430_v15, %v1287_v14  ;;  %v1432_v17 = vpop.f32.mrb[33].mxu1 }
 0x45f   : > { %v1433_v18 = vadd.f32 %v1432_v17, %v1287_v14 }
 0x460   : > { %2195 = vtanh.f32 %v1431_v16 }
 0x461   : > { %v1436_v20 = vpop.f32.mrb[34].mxu1  ;;  %2197 = vtanh.f32 %v1433_v18 }
 0x462   : > { %v1437_v21 = vadd.f32 %v1436_v20, %v1292_v19  ;;  %v1438_v22 = vpop.f32.mrb[35].mxu1  ;;  %v1337_v20 = vpop.permute.xlu0 %1336 }
 0x463   : > { %v1439_v23 = vadd.f32 %v1438_v22, %v1292_v19 }
 0x464   : > { %2199 = vtanh.f32 %v1437_v21 }
 0x465   : > { %2201 = vtanh.f32 %v1439_v23  ;;  %v1442_v6 = vpop.f32.mrb[36].mxu1 }
 0x466   : > { %v1443_v25 = vadd.f32 %v1442_v6, %v1297_v24  ;;  %v1444_v26 = vpop.f32.mrb[37].mxu1 }
 0x467   : > { %v1445_v27 = vadd.f32 %v1444_v26, %v1297_v24 }
 0x468   : > { %2203 = vtanh.f32 %v1443_v25 }
 0x469   : > { %v1448_v29 = vpop.f32.mrb[38].mxu1  ;;  %2205 = vtanh.f32 %v1445_v27 }
 0x46a   : > { %v1449_v30 = vadd.f32 %v1448_v29, %v1302_v28  ;;  %v1450_v31 = vpop.f32.mrb[39].mxu1  ;;  %v2196_v33 = vpop.eup %2195 }
 0x46b   : > { %v1451_v32 = vadd.f32 %v1450_v31, %v1302_v28  ;;  %v2198_v34 = vpop.eup %2197  ;;  %v1342_v28 = vpop.permute.xlu1 %1341 }
 0x46c   : > { %2207 = vtanh.f32 %v1449_v30 }
 0x46d   : > { %2209 = vtanh.f32 %v1451_v32  ;;  %v1454_v36 = vpop.f32.mrb[40].mxu1 }
 0x46e   : > { %v2200_v37 = vpop.eup %2199  ;;  %v1455_v38 = vadd.f32 %v1454_v36, %v1307_v35  ;;  %v1456_v39 = vpop.f32.mrb[41].mxu1 }
 0x46f   : > { %v2202_v40 = vpop.eup %2201  ;;  %v1457_v41 = vadd.f32 %v1456_v39, %v1307_v35  ;;  %v1929_v42 = vpack.c.bf16 %v2200_v37, %v2196_v33  ;;  %v1347_v35 = vpop.permute.xlu0 %1346 }
 0x470   : > { %v1927_v43 = vpack.c.bf16 %v2202_v40, %v2198_v34  ;;  %2211 = vtanh.f32 %v1455_v38 }
 0x471   : > { %v1460_v45 = vpop.f32.mrb[42].mxu1  ;;  %2213 = vtanh.f32 %v1457_v41 }
 0x472   : > { %v1461_v46 = vadd.f32 %v1460_v45, %v1312_v44  ;;  %v1462_v47 = vpop.f32.mrb[43].mxu1  ;;  %1928 = vmatprep.subr.bf16.mxu0 %v1927_v43  ;;  %v2204_v49 = vpop.eup %2203 }
 0x473   : > { %v1463_v48 = vadd.f32 %v1462_v47, %v1312_v44  ;;  %1930 = vmatpush1.bf16.msra.mxu0 %v1929_v42  ;;  %v2206_v50 = vpop.eup %2205  ;;  %v1352_v44 = vpop.permute.xlu1 %1351 }
 0x474   : > { %2215 = vtanh.f32 %v1461_v46 }
 0x475   : > { %2217 = vtanh.f32 %v1463_v48  ;;  %v1466_v52 = vpop.f32.mrb[44].mxu1 }
 0x476   : > { %v2208_v53 = vpop.eup %2207  ;;  %v1467_v54 = vadd.f32 %v1466_v52, %v1317_v51  ;;  %v1468_v55 = vpop.f32.mrb[45].mxu1 }
 0x477   : > { %v2210_v56 = vpop.eup %2209  ;;  %v1469_v57 = vadd.f32 %v1468_v55, %v1317_v51  ;;  %v1933_v58 = vpack.c.bf16 %v2208_v53, %v2204_v49  ;;  %v1357_v51 = vpop.permute.xlu0 %1356 }
 0x478   : > { %v1931_v59 = vpack.c.bf16 %v2210_v56, %v2206_v50  ;;  %2219 = vtanh.f32 %v1467_v54 }
 0x479   : > { %v1472_v61 = vpop.f32.mrb[46].mxu1  ;;  %2221 = vtanh.f32 %v1469_v57 }
 0x47a   : > { %v1473_v62 = vadd.f32 %v1472_v61, %v1322_v60  ;;  %v1474_v63 = vpop.f32.mrb[47].mxu1  ;;  %1932 = vmatprep.subr.bf16.mxu0 %v1931_v59  ;;  %v2212_v1 = vpop.eup %2211 }
 0x47b   : > { %v1475_v0 = vadd.f32 %v1474_v63, %v1322_v60  ;;  %1934 = vmatpush1.bf16.msra.mxu0 %v1933_v58  ;;  %v2214_v2 = vpop.eup %2213  ;;  %v1362_v60 = vpop.permute.xlu1 %1361 }
 0x47c   : > { %2223 = vtanh.f32 %v1473_v62 }
 0x47d   : > { %2225 = vtanh.f32 %v1475_v0  ;;  %v1478_v4 = vpop.f32.mrb[48].mxu1 }
 0x47e   : > { %v2216_v5 = vpop.eup %2215  ;;  %v1479_v7 = vadd.f32 %v1478_v4, %v1327_v3  ;;  %v1480_v8 = vpop.f32.mrb[49].mxu1 }
 0x47f   : > { %v2218_v9 = vpop.eup %2217  ;;  %v1481_v10 = vadd.f32 %v1480_v8, %v1327_v3  ;;  %v1937_v11 = vpack.c.bf16 %v2216_v5, %v2212_v1 }
 0x480   : > { %v1935_v12 = vpack.c.bf16 %v2218_v9, %v2214_v2  ;;  %2227 = vtanh.f32 %v1479_v7 }
 0x481   : > { %v1484_v14 = vpop.f32.mrb[50].mxu1  ;;  %2229 = vtanh.f32 %v1481_v10 }
 0x482   : > { %v1485_v15 = vadd.f32 %v1484_v14, %v1332_v13  ;;  %v1486_v16 = vpop.f32.mrb[51].mxu1  ;;  %1936 = vmatprep.subr.bf16.mxu0 %v1935_v12  ;;  %v2220_v18 = vpop.eup %2219  ;;  %v1558_v14 = vld [vmem:[%s2946_s5] sm:$0x1] }
 0x483   : > { %v1487_v17 = vadd.f32 %v1486_v16, %v1332_v13  ;;  %1938 = vmatpush1.bf16.msra.mxu0 %v1937_v11  ;;  %v2222_v19 = vpop.eup %2221 }
 0x484   : > { %2231 = vtanh.f32 %v1485_v15  ;;  %v1564_v15 = vlaneseq }
 0x485   : > { %2233 = vtanh.f32 %v1487_v17  ;;  %v1490_v21 = vpop.f32.mrb[52].mxu1 }
 0x486   : > { %v2224_v22 = vpop.eup %2223  ;;  %v1491_v23 = vadd.f32 %v1490_v21, %v1337_v20  ;;  %v1492_v24 = vpop.f32.mrb[53].mxu1  ;;  %v1565_v16 = vshrl.u32 %v1564_v15, 7  ;;  %vm1661_vm1 = vcmp.lt.s32.totalorder %v1564_v15, 256 }
 0x487   : > { %v2226_v6 = vpop.eup %2225  ;;  %v1493_v25 = vadd.f32 %v1492_v24, %v1337_v20  ;;  %v1941_v26 = vpack.c.bf16 %v2224_v22, %v2220_v18  ;;  %v1562_v18 = vpop.permute.xlu0 %1561  ;;  %v2329_v24 = vmov 1966171168  }
 0x488   : > { %v1939_v27 = vpack.c.bf16 %v2226_v6, %v2222_v19  ;;  %2235 = vtanh.f32 %v1491_v23  ;;  %v1566_v17 = vsub.s32 0, %v1565_v16  ;;  %v1645_v6 = vunpack.c.l.s4 %v2329_v24 }
 0x489   : > { %v1496_v29 = vpop.f32.mrb[54].mxu1  ;;  %2237 = vtanh.f32 %v1493_v25 }
 0x48a   : > { %v1497_v30 = vadd.f32 %v1496_v29, %v1342_v28  ;;  %v1498_v31 = vpop.f32.mrb[55].mxu1  ;;  %1940 = vmatprep.subr.bf16.mxu0 %v1939_v27  ;;  %v2228_v33 = vpop.eup %2227  ;;  %v1567_v19 = vrot.slane %v1562_v18, %v1566_v17  ;;  %v1646_v25 = vunpack.c.0.s8 %v1645_v6 }
 0x48b   : > { %v1499_v32 = vadd.f32 %v1498_v31, %v1342_v28  ;;  %1942 = vmatpush1.bf16.msra.mxu0 %v1941_v26  ;;  %v2230_v34 = vpop.eup %2229 }
 0x48c   : > { %2239 = vtanh.f32 %v1497_v30  ;;  %v1649_v27 = vsub.s32 %v1646_v25, %v1565_v16 }
 0x48d   : > { %2241 = vtanh.f32 %v1499_v32  ;;  %v1502_v36 = vpop.f32.mrb[56].mxu1 }
 0x48e   : > { %v2232_v37 = vpop.eup %2231  ;;  %v1503_v38 = vadd.f32 %v1502_v36, %v1347_v35  ;;  %v1504_v39 = vpop.f32.mrb[57].mxu1 }
 0x48f   : > { %v2234_v40 = vpop.eup %2233  ;;  %v1505_v41 = vadd.f32 %v1504_v39, %v1347_v35  ;;  %v1945_v42 = vpack.c.bf16 %v2232_v37, %v2228_v33 }
 0x490   : > { %v1943_v43 = vpack.c.bf16 %v2234_v40, %v2230_v34  ;;  %2243 = vtanh.f32 %v1503_v38 }
 0x491   : > { %v1508_v45 = vpop.f32.mrb[58].mxu1  ;;  %2245 = vtanh.f32 %v1505_v41 }
 0x492   : > { %v1509_v46 = vadd.f32 %v1508_v45, %v1352_v44  ;;  %v1510_v47 = vpop.f32.mrb[59].mxu1  ;;  %1944 = vmatprep.subr.bf16.mxu0 %v1943_v43  ;;  %v2236_v49 = vpop.eup %2235 }
 0x493   : > { %v1511_v48 = vadd.f32 %v1510_v47, %v1352_v44  ;;  %1946 = vmatpush1.bf16.msra.mxu0 %v1945_v42  ;;  %v2238_v50 = vpop.eup %2237 }
 0x494   : > { %2247 = vtanh.f32 %v1509_v46 }
 0x495   : > { %2249 = vtanh.f32 %v1511_v48  ;;  %v1514_v52 = vpop.f32.mrb[60].mxu1 }
 0x496   : > { %v2240_v53 = vpop.eup %2239  ;;  %v1515_v54 = vadd.f32 %v1514_v52, %v1357_v51  ;;  %v1516_v55 = vpop.f32.mrb[61].mxu1 }
 0x497   : > { %v2242_v56 = vpop.eup %2241  ;;  %v1517_v57 = vadd.f32 %v1516_v55, %v1357_v51  ;;  %v1949_v58 = vpack.c.bf16 %v2240_v53, %v2236_v49 }
 0x498   : > { %v1947_v59 = vpack.c.bf16 %v2242_v56, %v2238_v50  ;;  %2251 = vtanh.f32 %v1515_v54 }
 0x499   : > { %v1520_v61 = vpop.f32.mrb[62].mxu1  ;;  %2253 = vtanh.f32 %v1517_v57 }
 0x49a   : > { %v1521_v62 = vadd.f32 %v1520_v61, %v1362_v60  ;;  %v1522_v63 = vpop.f32.mrb[63].mxu1  ;;  %1948 = vmatprep.subr.bf16.mxu0 %v1947_v59  ;;  %v2244_v1 = vpop.eup %2243 }
 0x49b   : > { %v1523_v0 = vadd.f32 %v1522_v63, %v1362_v60  ;;  %1950 = vmatpush1.bf16.msra.mxu0 %v1949_v58  ;;  %v2246_v2 = vpop.eup %2245 }
 0x49c   : > { %2255 = vtanh.f32 %v1521_v62 }
 0x49d   : > { %2257 = vtanh.f32 %v1523_v0 }
 0x49e   : > { %v2248_v3 = vpop.eup %2247 }
 0x49f   : > { %v2250_v4 = vpop.eup %2249  ;;  %v1953_v5 = vpack.c.bf16 %v2248_v3, %v2244_v1 }
 0x4a0   : > { %v1951_v7 = vpack.c.bf16 %v2250_v4, %v2246_v2 }
 0x4a2   : > { %1952 = vmatprep.subr.bf16.mxu0 %v1951_v7  ;;  %v2252_v8 = vpop.eup %2251 }
 0x4a3   : > { %1954 = vmatpush1.bf16.msra.mxu0 %v1953_v5  ;;  %v2254_v9 = vpop.eup %2253 }
 0x4a6   : > { %v2256_v10 = vpop.eup %2255 }
 0x4a7   : > { %v2258_v11 = vpop.eup %2257  ;;  %v1957_v12 = vpack.c.bf16 %v2256_v10, %v2252_v8 }
 0x4a8   : > { %v1955_v13 = vpack.c.bf16 %v2258_v11, %v2254_v9 }
 0x4aa   : > { %1956 = vmatprep.subr.bf16.mxu0 %v1955_v13 }
 0x4ab   : > { %1958 = vmatpush1.bf16.msra.mxu0 %v1957_v12 }
 0x4ae   : > { %1633 = vmatmul.mubr.f32.vlgmr.msra.gmra.mrb[64].mxu0 %v1558_v14 }
 0x581   : > { %v1634_v20 = vpop.f32.mrb[64].mxu0 }
 0x582   : > { %v1635_v21 = vadd.f32 %v1634_v20, %v1567_v19  ;;  %v1636_v22 = vpop.f32.mrb[65].mxu0 }
 0x583   : > { %v1637_v23 = vadd.f32 %v1636_v22, %v1567_v19 }
 0x584   : > { %2259 = vtanh.f32 %v1635_v21 }
 0x585   : > { %2261 = vtanh.f32 %v1637_v23 }
 0x58e   : > { %v2260_v26 = vpop.eup %2259 }
 0x58f   : > { %v2262_v28 = vpop.eup %2261 }
 0x590   : > { %v1643_v29 = vcombine.low %v2260_v26, %v2262_v28 }
 0x592   : > { %v1650_v30 = vrot.slane %v1643_v29, %v1649_v27 }
 0x594   : > { %v1657_v31 = vrot.slane %v1650_v30, %v1649_v27 }
 0x596   : > { %1663 = vst.msk [vmem:[%s274_s25] sm:$0x3] %vm1661_vm1, %v1657_v31 }
 0x597   : > { %2276 = shalt.err (!%p2273_p3)
}
 0x598   : > { %s2277_s19 = scalar_lea.hbm %s2899_s14, 32  ;;  %s2281_s22 = scalar_lea.hbm %s2948_s7, 64 }
 0x599   : > { %p2278_p4 = scmp.ne.s32.totalorder %s2899_s14, %s2277_s19  ;;  %p2282_p9 = scmp.lt.u32.totalorder %s2899_s14, %s2948_s7 }
 0x59a   : > { %p2283_p10 = scmp.lt.u32.totalorder %s2281_s22, %s2277_s19  ;;  %p2285_p12 = scmp.lt.u32.totalorder %s2277_s19, %s2899_s14 }
 0x59b   : > { %p2279_p7 = pnand %p2278_p4, %p2412_p5 }
 0x59c   : > { %p2284_p11 = por %p2283_p10, %p2282_p9 }
 0x59d   : > { %p2280_p8 = pneg %p2279_p7 }
 0x59e   : > { %p2286_p13 = por %p2285_p12, %p2284_p11 }
 0x5a0   : > { %p2287_p0 = pnand %p2286_p13, %p2280_p8 }
 0x5a2   : > { %2290 = shalt.err (!%p2287_p0)
}
 0x5a3   : > { %1959 = dma.vmem_to_hbm [thread:$0]  (%p2412_p5), %s2901_s30, 32, %s2899_s14, %s1665_s15  }
 0x5a4 PF: > { %p1965_p1 = scmp.ge.s32.totalorder %s2325_s29, 2  ;;  %s1691_s25 = sand.u32 1, %s2313_s26  }
 0x5a5   : > { %s1692_s9 = scalar_lea.sflag [#allocation4], %s1691_s25 }
 0x5a6   : > { %p1962_p2 = pnand %p1965_p1, %p2416_p6 }
 0x5a8   : > { %2308 = dma.done.wait (!%p1962_p2), %s1692_s9, 32  }
 0x5a9   : > { %2310 = vsyncadd (!%p1962_p2), %s1692_s9, 4294967264  ;;  %p19_p3 = scmp.ge.s32.totalorder %s2399_s8, 4   ;;  %s2951_s26 = smov %s2317_s27 }
 0x5aa   : > { %s2952_s27 = smov %s2321_s28  ;;  %s2953_s28 = smov %s2410_s11 }
 0x5ab   : > { %s2954_s29 = smov %s2399_s8  ;;  %21 = sbr.rel (!%p19_p3) target bundleno = 6 (0x6), region = 87 }
 0x5b2   :  { %1697 = vsyncpa [#allocation4], 1 }
 0x5b3   :  { %1699 = vsyncpa [#allocation4 + $0x1], 1 }

</bundles_post_ra>
